<compile_context>
chip_gen: v6e
topology: v6e:2x2x1
jax: 0.10.0
libtpu: 0.0.40
codegen_flags: <defaults>
</compile_context>

<pallas_src>
import functools

import jax
import jax.numpy as jnp
from jax.experimental import pallas as pl
from jax.experimental.pallas import tpu as pltpu

EPS = 1e-6
_MIB = 1024 * 1024


def _cdiv(a, b):
    return -(-a // b)


# --------------------------------------------------------------------------- #
# Kernels
# --------------------------------------------------------------------------- #
def residual_connection_kernel(alpha_ref, beta_ref, x_ref, w_ref, b_ref, o_ref):
    """Resident-weight path: 1-D grid over row tiles, full bf16 W kept in VMEM."""
    x = x_ref[...].astype(jnp.float32)              # (TM, D)
    d = x.shape[-1]

    # LayerNormalization (torch semantics: unbiased std, eps added to std,
    # scalar alpha / beta).
    mean = jnp.mean(x, axis=-1, keepdims=True)
    diff = x - mean
    var_unbiased = jnp.sum(diff * diff, axis=-1, keepdims=True) * (1.0 / (d - 1))
    # Per-row (TM, 1) EUP reciprocal instead of a (TM, D) VALU divide.
    # approx=True deviates slightly from torch's exact divide by (std+eps);
    # well inside the bf16-matmul noise of this kernel.
    inv = pl.reciprocal(jnp.sqrt(var_unbiased) + EPS, approx=True)
    # Affine + bf16 cast fused: the MXU operand is formed in one pass and the
    # f32 diff/normed temporaries die before the matmul (fewer live vregs).
    normed = ((alpha_ref[0] * inv) * diff + beta_ref[0]).astype(jnp.bfloat16)

    # sublayer Linear(D, D): bf16 MXU operands, f32 accumulation.
    sub = jnp.dot(normed, w_ref[...], preferred_element_type=jnp.float32)

    # dropout (inference => identity) + residual add.  x is re-read from VMEM so
    # its f32 copy is not held live across the MXU call (vld slots are cheap).
    o_ref[...] = (
        x_ref[...].astype(jnp.float32) + sub + b_ref[...].astype(jnp.float32)
    ).astype(o_ref.dtype)


def residual_connection_ktiled_kernel(
    alpha_ref, beta_ref, x_ref, w_ref, b_ref, o_ref, normed_ref, acc_ref
):
    """K-tiled path for large D: grid = (row tiles, D // tk); W streamed as (tk, D)."""
    k = pl.program_id(1)
    tk = w_ref.shape[0]

    @pl.when(k == 0)
    def _():
        x = x_ref[...].astype(jnp.float32)
        d = x.shape[-1]
        mean = jnp.mean(x, axis=-1, keepdims=True)
        diff = x - mean
        var_unbiased = jnp.sum(diff * diff, axis=-1, keepdims=True) * (1.0 / (d - 1))
        inv = pl.reciprocal(jnp.sqrt(var_unbiased) + EPS, approx=True)
        normed_ref[...] = ((alpha_ref[0] * inv) * diff + beta_ref[0]).astype(
            jnp.bfloat16
        )
        acc_ref[...] = jnp.zeros_like(acc_ref)

    k0 = pl.multiple_of(k * tk, tk)
    acc_ref[...] += jnp.dot(
        normed_ref[:, pl.ds(k0, tk)], w_ref[...], preferred_element_type=jnp.float32
    )

    @pl.when(k == pl.num_programs(1) - 1)
    def _():
        o_ref[...] = (
            x_ref[...].astype(jnp.float32)
            + acc_ref[...]
            + b_ref[...].astype(jnp.float32)
        ).astype(o_ref.dtype)


# --------------------------------------------------------------------------- #
# Tiling / VMEM heuristics
# --------------------------------------------------------------------------- #
def _vmem_budget_bytes():
    """~75% of the chip's physical VMEM (64 MiB/TC on v7x, 128 MiB on v5e/v6e)."""
    try:
        cap = int(pltpu.get_tpu_info().vmem_capacity_bytes)
    except Exception:
        cap = 64 * _MIB                      # conservative default (v7x per-TC)
    return max(16 * _MIB, (3 * cap) // 4)


def _resident_vmem_bytes(tm, d, out_bytes, w_bufs):
    return (
        2 * tm * d * 4            # double-buffered f32 x tiles
        + 2 * tm * d * out_bytes  # double-buffered output tiles
        + w_bufs * 2 * d * d      # bf16 resident weight
        + 2 * d * 4               # bias
        + 3 * tm * d * 4          # headroom for f32 diff/normed/sub temporaries
    )


def _choose_tm_resident(n, d, out_bytes, w_bufs, budget):
    # HBM-bandwidth-bound at realistic D (AI ~ D/4 flop/byte), so make the row
    # tile big: target >= ~2 MiB of f32 x per tile (measured roofline knee is
    # around 512-1024 rows), amortizing the ~0.35us per-grid-step overhead.
    target = max(512, (2 << 20) // (4 * d))
    if target >= n:
        tm = n                                        # single full-extent block
    else:
        tm = max(8, (target // 8) * 8)
        rows = _cdiv(n, tm)
        if 1 < rows < 4:
            # Give both v7x TensorCores >= 2 blocks each for pipelined overlap,
            # but only if tiles stay past the bandwidth knee (>= 512 rows).
            cand = (_cdiv(n, 4) + 7) // 8 * 8
            if cand >= 512:
                tm = cand
    while tm > 8 and _resident_vmem_bytes(tm, d, out_bytes, w_bufs) > budget:
        tm = max(8, ((tm // 2) // 8) * 8)
    return tm


def _ktiled_vmem_bytes(tm, tk, d, out_bytes):
    return (
        2 * tm * d * 4            # double-buffered f32 x tiles (change per row block)
        + 2 * tm * d * out_bytes  # double-buffered output tiles
        + 2 * tk * d * 2          # double-buffered bf16 weight slab
        + tm * d * 2              # bf16 normed(x) scratch
        + tm * d * 4              # f32 accumulator scratch
        + 2 * d * 4               # bias
        + 2 * tm * d * 4          # headroom
    )


def _choose_ktiled_tiles(n, d, out_bytes, budget):
    tk = 128
    for cand in (4096, 2048, 1024, 512, 256, 128):
        # double-buffered bf16 slab must stay under ~1/4 of the budget
        if d % cand == 0 and 2 * 2 * cand * d <= budget // 4:
            tk = cand
            break
    tm = n if n <= 512 else 512
    while tm > 8 and _ktiled_vmem_bytes(tm, tk, d, out_bytes) > budget:
        tm = max(8, ((tm // 2) // 8) * 8)
    return tm, tk


# --------------------------------------------------------------------------- #
# pallas_call builders (cached: no per-call re-tracing or capability probing)
# --------------------------------------------------------------------------- #
@functools.lru_cache(maxsize=None)
def _build_resident_call(n, d, tm, out_dtype_name, single_buffer_weights):
    out_dtype = jnp.dtype(out_dtype_name)
    out_bytes = out_dtype.itemsize
    w_bufs = 1 if single_buffer_weights else 2
    w_kwargs = (
        {"pipeline_mode": pl.Buffered(buffer_count=1)} if single_buffer_weights else {}
    )

    budget = _vmem_budget_bytes()
    need = _resident_vmem_bytes(tm, d, out_bytes, w_bufs)
    vmem_limit = int(min(max(need + 4 * _MIB, 16 * _MIB), budget))

    grid_rows = _cdiv(n, tm)
    flops = 2 * n * d * d + 10 * n * d
    bytes_accessed = n * d * (4 + out_bytes) + 2 * d * d + 4 * d

    return pl.pallas_call(
        residual_connection_kernel,
        out_shape=jax.ShapeDtypeStruct((n, d), out_dtype),
        grid_spec=pltpu.PrefetchScalarGridSpec(
            num_scalar_prefetch=0,
            grid=(grid_rows,),
            in_specs=[
                pl.BlockSpec(memory_space=pltpu.MemorySpace.SMEM),    # alpha (1,)
                pl.BlockSpec(memory_space=pltpu.MemorySpace.SMEM),    # beta  (1,)
                pl.BlockSpec((tm, d), lambda i: (i, 0)),              # x row tile
                pl.BlockSpec((d, d), lambda i: (0, 0), **w_kwargs),   # resident bf16 W
                pl.BlockSpec((1, d), lambda i: (0, 0), **w_kwargs),   # resident bias
            ],
            out_specs=pl.BlockSpec((tm, d), lambda i: (i, 0)),
        ),
        compiler_params=pltpu.CompilerParams(
            dimension_semantics=("parallel",),      # shard row tiles across v7x TCs
            vmem_limit_bytes=vmem_limit,
        ),
        cost_estimate=pl.CostEstimate(
            flops=flops, transcendentals=2 * n, bytes_accessed=bytes_accessed
        ),
    )


@functools.lru_cache(maxsize=None)
def _build_ktiled_call(n, d, tm, tk, out_dtype_name):
    out_dtype = jnp.dtype(out_dtype_name)
    out_bytes = out_dtype.itemsize

    budget = _vmem_budget_bytes()
    need = _ktiled_vmem_bytes(tm, tk, d, out_bytes)
    vmem_limit = int(min(max(need + 4 * _MIB, 16 * _MIB), budget))

    grid = (_cdiv(n, tm), d // tk)
    flops = 2 * n * d * d + 10 * n * d
    bytes_accessed = n * d * (4 + out_bytes) + 2 * d * d + 4 * d

    return pl.pallas_call(
        residual_connection_ktiled_kernel,
        out_shape=jax.ShapeDtypeStruct((n, d), out_dtype),
        grid_spec=pltpu.PrefetchScalarGridSpec(
            num_scalar_prefetch=0,
            grid=grid,
            in_specs=[
                pl.BlockSpec(memory_space=pltpu.MemorySpace.SMEM),    # alpha (1,)
                pl.BlockSpec(memory_space=pltpu.MemorySpace.SMEM),    # beta  (1,)
                pl.BlockSpec((tm, d), lambda i, k: (i, 0)),           # x (held over k)
                pl.BlockSpec((tk, d), lambda i, k: (k, 0)),           # streamed W slab
                pl.BlockSpec((1, d), lambda i, k: (0, 0)),            # bias
            ],
            out_specs=pl.BlockSpec((tm, d), lambda i, k: (i, 0)),
            scratch_shapes=[
                pltpu.VMEM((tm, d), jnp.bfloat16),    # normed(x), computed at k == 0
                pltpu.VMEM((tm, d), jnp.float32),     # matmul accumulator
            ],
        ),
        compiler_params=pltpu.CompilerParams(
            dimension_semantics=("parallel", "arbitrary"),
            vmem_limit_bytes=vmem_limit,
        ),
        cost_estimate=pl.CostEstimate(
            flops=flops, transcendentals=2 * n, bytes_accessed=bytes_accessed
        ),
    )


# --------------------------------------------------------------------------- #
# Public wrapper
# --------------------------------------------------------------------------- #
_SINGLE_BUFFER_W_OK = True   # flipped at most once if this jax build rejects Buffered(1)


def residual_connection(x, w, b, alpha, beta, *, out_dtype=None):
    """x: (N, D) f32; w: (D, D); b: (D,); alpha, beta: (1,) scalars.

    Pass out_dtype=jnp.bfloat16 to halve HBM write traffic when the surrounding
    model tolerates bf16 activations.  No host sync, no pad/slice round trip.
    """
    global _SINGLE_BUFFER_W_OK

    n, d = x.shape
    assert d % 128 == 0, "hidden dim must be a multiple of 128 (TPU lane width)"
    assert w.shape == (d, d) and b.shape == (d,)

    out_dtype = jnp.dtype(x.dtype if out_dtype is None else out_dtype)
    out_bytes = out_dtype.itemsize

    w_bf16 = w.astype(jnp.bfloat16)                 # bf16 MXU operand, half HBM/VMEM
    b2d = b.astype(jnp.float32).reshape(1, d)
    alpha = alpha.astype(jnp.float32).reshape(1)
    beta = beta.astype(jnp.float32).reshape(1)

    budget = _vmem_budget_bytes()

    # Large D (bf16 W > ~1/4 of VMEM, e.g. D >= ~2.8K on v7x): stream W in
    # (tk, D) slabs with an f32 accumulator instead of keeping it resident.
    if 2 * d * d > budget // 4:
        tm, tk = _choose_ktiled_tiles(n, d, out_bytes, budget)
        return _build_ktiled_call(n, d, tm, tk, out_dtype.name)(
            alpha, beta, x, w_bf16, b2d
        )

    if _SINGLE_BUFFER_W_OK:
        tm = _choose_tm_resident(n, d, out_bytes, 1, budget)
        try:
            return _build_resident_call(n, d, tm, out_dtype.name, True)(
                alpha, beta, x, w_bf16, b2d
            )
        except Exception:
            # This jax build rejected pipeline_mode=pl.Buffered(1).  Fall back
            # once to the default double-buffered weight spec; a genuine failure
            # will re-raise from the call below, so nothing is silently masked.
            _SINGLE_BUFFER_W_OK = False

    # Fallback: W is double-buffered, so re-derive tm with the doubled footprint.
    tm = _choose_tm_resident(n, d, out_bytes, 2, budget)
    return _build_resident_call(n, d, tm, out_dtype.name, False)(
        alpha, beta, x, w_bf16, b2d
    )


# --------------------------------------------------------------------------- #
# Pure-JAX reference and demo
# --------------------------------------------------------------------------- #
def reference(x, w_bf16, b, alpha, beta):
    mean = jnp.mean(x, axis=-1, keepdims=True)
    std = jnp.std(x, axis=-1, keepdims=True, ddof=1)   # torch-style unbiased std
    normed = alpha[0] * (x - mean) / (std + EPS) + beta[0]
    sub = jnp.dot(
        normed.astype(jnp.bfloat16), w_bf16, preferred_element_type=jnp.float32
    ) + b
    return x + sub                                      # dropout identity (eval mode)


if __name__ == "__main__":
    key = jax.random.PRNGKey(0)
    batch, seq, hidden = 2, 64, 128       # D multiple of 128 -> lane-dense tiles
    n = batch * seq

    kx, kw, kb = jax.random.split(key, 3)
    x = jax.random.normal(kx, (n, hidden), dtype=jnp.float32)

    # LayerNormalization params (alpha=1, bias=0, as in __init__)
    alpha = jnp.ones((1,), dtype=jnp.float32)
    beta = jnp.zeros((1,), dtype=jnp.float32)

    # Deterministic representative sublayer (Linear) params
    w = jax.random.normal(kw, (hidden, hidden), dtype=jnp.float32) * (hidden ** -0.5)
    b = jax.random.normal(kb, (hidden,), dtype=jnp.float32) * 0.01

    out = jax.block_until_ready(residual_connection(x, w, b, alpha, beta))

    ref = reference(x, w.astype(jnp.bfloat16), b, alpha, beta)
    err = jnp.max(jnp.abs(out - ref))
    assert jnp.allclose(out, ref, atol=2e-2, rtol=2e-2), f"max abs err {err}"
    print("KERNEL_OK")
</pallas_src>

<mosaic_0001>
module attributes {stable_mosaic.version = 11 : i64} {
  func.func @residual_connection_kernel(%arg0: i32, %arg1: memref<1xf32, #tpu.memory_space<smem>>, %arg2: memref<1xf32, #tpu.memory_space<smem>>, %arg3: memref<128x128xf32, #tpu.memory_space<vmem>>, %arg4: memref<128x128xbf16, #tpu.memory_space<vmem>>, %arg5: memref<1x128xf32, #tpu.memory_space<vmem>>, %arg6: memref<128x128xf32, #tpu.memory_space<vmem>>) attributes {dimension_semantics = [#tpu.dimension_semantics<parallel>], iteration_bounds = array<i64: 1>, scalar_prefetch = 0 : i64, scratch_operands = 0 : i64, tpu.core_type = #tpu.core_type<tc>, window_params = [{transform_indices = @transform_0, window_bounds = array<i64: 1>}, {transform_indices = @transform_1, window_bounds = array<i64: 1>}, {transform_indices = @transform_2, window_bounds = array<i64: 128, 128>}, {pipeline_mode = #tpu.pipeline_mode<synchronous>, transform_indices = @transform_3, window_bounds = array<i64: 128, 128>}, {pipeline_mode = #tpu.pipeline_mode<synchronous>, transform_indices = @transform_4, window_bounds = array<i64: 1, 128>}, {transform_indices = @transform_5, window_bounds = array<i64: 128, 128>}]} {
    %c0 = arith.constant 0 : index
    %c0_0 = arith.constant 0 : index
    %0 = vector.load %arg3[%c0, %c0_0] : memref<128x128xf32, #tpu.memory_space<vmem>>, vector<128x128xf32>
    %cst = arith.constant dense<0.000000e+00> : vector<128xf32>
    %1 = vector.multi_reduction <add>, %0, %cst [1] : vector<128x128xf32> to vector<128xf32>
    %2 = vector.shape_cast %1 : vector<128xf32> to vector<128x1xf32>
    %cst_1 = arith.constant 1.280000e+02 : f32
    %3 = vector.broadcast %cst_1 : f32 to vector<128x1xf32>
    %4 = arith.divf %2, %3 : vector<128x1xf32>
    %5 = vector.broadcast %4 : vector<128x1xf32> to vector<128x128xf32>
    %6 = arith.subf %0, %5 : vector<128x128xf32>
    %7 = arith.mulf %6, %6 : vector<128x128xf32>
    %cst_2 = arith.constant dense<0.000000e+00> : vector<128xf32>
    %8 = vector.multi_reduction <add>, %7, %cst_2 [1] : vector<128x128xf32> to vector<128xf32>
    %9 = vector.shape_cast %8 : vector<128xf32> to vector<128x1xf32>
    %cst_3 = arith.constant 0.00787401571 : f32
    %10 = vector.broadcast %cst_3 : f32 to vector<128x1xf32>
    %11 = arith.mulf %9, %10 : vector<128x1xf32>
    %12 = math.sqrt %11 : vector<128x1xf32>
    %cst_4 = arith.constant 9.99999997E-7 : f32
    %13 = vector.broadcast %cst_4 : f32 to vector<128x1xf32>
    %14 = arith.addf %12, %13 : vector<128x1xf32>
    %15 = tpu.reciprocal %14 {approx = true} : vector<128x1xf32> -> vector<128x1xf32>
    %c0_5 = arith.constant 0 : index
    %16 = memref.load %arg1[%c0_5] : memref<1xf32, #tpu.memory_space<smem>>
    %17 = vector.broadcast %16 : f32 to vector<128x1xf32>
    %18 = arith.mulf %17, %15 : vector<128x1xf32>
    %19 = vector.broadcast %18 : vector<128x1xf32> to vector<128x128xf32>
    %20 = arith.mulf %19, %6 : vector<128x128xf32>
    %c0_6 = arith.constant 0 : index
    %21 = memref.load %arg2[%c0_6] : memref<1xf32, #tpu.memory_space<smem>>
    %22 = vector.broadcast %21 : f32 to vector<128x128xf32>
    %23 = arith.addf %20, %22 : vector<128x128xf32>
    %24 = arith.truncf %23 : vector<128x128xf32> to vector<128x128xbf16>
    %c0_7 = arith.constant 0 : index
    %c0_8 = arith.constant 0 : index
    %25 = vector.load %arg4[%c0_7, %c0_8] : memref<128x128xbf16, #tpu.memory_space<vmem>>, vector<128x128xbf16>
    %cst_9 = arith.constant dense<0.000000e+00> : vector<128x128xf32>
    %26 = tpu.matmul %24, %25, %cst_9 {dimension_numbers = #tpu.dot_dimension_numbers<[1], [0], [0], [1], [0, 0, 1, 1], [], []>} : vector<128x128xbf16>, vector<128x128xbf16>, vector<128x128xf32> -> vector<128x128xf32>
    %c0_10 = arith.constant 0 : index
    %c0_11 = arith.constant 0 : index
    %27 = vector.load %arg3[%c0_10, %c0_11] : memref<128x128xf32, #tpu.memory_space<vmem>>, vector<128x128xf32>
    %28 = arith.addf %27, %26 : vector<128x128xf32>
    %c0_12 = arith.constant 0 : index
    %c0_13 = arith.constant 0 : index
    %29 = vector.load %arg5[%c0_12, %c0_13] : memref<1x128xf32, #tpu.memory_space<vmem>>, vector<1x128xf32>
    %30 = vector.broadcast %29 : vector<1x128xf32> to vector<128x128xf32>
    %31 = arith.addf %28, %30 : vector<128x128xf32>
    %c0_14 = arith.constant 0 : index
    %c0_15 = arith.constant 0 : index
    %32 = vector.load %arg6[%c0_14, %c0_15] : memref<128x128xf32, #tpu.memory_space<vmem>>, vector<128x128xf32>
    tpu.vector_store %arg6[%c0_14, %c0_15], %31 {strides = array<i32>} : memref<128x128xf32, #tpu.memory_space<vmem>>, vector<128x128xf32>,
    return
  }
  func.func @transform_0(%arg0: i32) -> i32 {
    %c0_i32 = arith.constant 0 : i32
    %c0_i32_0 = arith.constant 0 : i32
    return %c0_i32 : i32
  }
  func.func @transform_1(%arg0: i32) -> i32 {
    %c0_i32 = arith.constant 0 : i32
    %c0_i32_0 = arith.constant 0 : i32
    return %c0_i32 : i32
  }
  func.func @transform_2(%arg0: i32) -> (i32, i32) {
    %c0_i32 = arith.constant 0 : i32
    %c0_i32_0 = arith.constant 0 : i32
    return %arg0, %c0_i32 : i32, i32
  }
  func.func @transform_3(%arg0: i32) -> (i32, i32) {
    %c0_i32 = arith.constant 0 : i32
    %c0_i32_0 = arith.constant 0 : i32
    %c0_i32_1 = arith.constant 0 : i32
    return %c0_i32, %c0_i32_0 : i32, i32
  }
  func.func @transform_4(%arg0: i32) -> (i32, i32) {
    %c0_i32 = arith.constant 0 : i32
    %c0_i32_0 = arith.constant 0 : i32
    %c0_i32_1 = arith.constant 0 : i32
    return %c0_i32, %c0_i32_0 : i32, i32
  }
  func.func @transform_5(%arg0: i32) -> (i32, i32) {
    %c0_i32 = arith.constant 0 : i32
    %c0_i32_0 = arith.constant 0 : i32
    return %arg0, %c0_i32 : i32, i32
  }
}

module attributes {stable_mosaic.version = 11 : i64} {
  func.func @residual_connection_kernel(%arg0: i32, %arg1: memref<1xf32, #tpu.memory_space<smem>>, %arg2: memref<1xf32, #tpu.memory_space<smem>>, %arg3: memref<128x128xf32, #tpu.memory_space<vmem>>, %arg4: memref<128x128xbf16, #tpu.memory_space<vmem>>, %arg5: memref<1x128xf32, #tpu.memory_space<vmem>>, %arg6: memref<128x128xf32, #tpu.memory_space<vmem>>) attributes {dimension_semantics = [#tpu.dimension_semantics<parallel>], iteration_bounds = array<i64: 1>, scalar_prefetch = 0 : i64, scratch_operands = 0 : i64, tpu.core_type = #tpu.core_type<tc>, window_params = [{transform_indices = @transform_0, window_bounds = array<i64: 1>}, {transform_indices = @transform_1, window_bounds = array<i64: 1>}, {transform_indices = @transform_2, window_bounds = array<i64: 128, 128>}, {pipeline_mode = #tpu.pipeline_mode<synchronous>, transform_indices = @transform_3, window_bounds = array<i64: 128, 128>}, {pipeline_mode = #tpu.pipeline_mode<synchronous>, transform_indices = @transform_4, window_bounds = array<i64: 1, 128>}, {transform_indices = @transform_5, window_bounds = array<i64: 128, 128>}]} {
    %c0 = arith.constant 0 : index
    %c0_0 = arith.constant 0 : index
    %0 = vector.load %arg3[%c0, %c0_0] : memref<128x128xf32, #tpu.memory_space<vmem>>, vector<128x128xf32>
    %cst = arith.constant dense<0.000000e+00> : vector<128xf32>
    %1 = vector.multi_reduction <add>, %0, %cst [1] : vector<128x128xf32> to vector<128xf32>
    %2 = vector.shape_cast %1 : vector<128xf32> to vector<128x1xf32>
    %cst_1 = arith.constant 1.280000e+02 : f32
    %3 = vector.broadcast %cst_1 : f32 to vector<128x1xf32>
    %4 = arith.divf %2, %3 : vector<128x1xf32>
    %5 = vector.broadcast %4 : vector<128x1xf32> to vector<128x128xf32>
    %6 = arith.subf %0, %5 : vector<128x128xf32>
    %7 = arith.mulf %6, %6 : vector<128x128xf32>
    %cst_2 = arith.constant dense<0.000000e+00> : vector<128xf32>
    %8 = vector.multi_reduction <add>, %7, %cst_2 [1] : vector<128x128xf32> to vector<128xf32>
    %9 = vector.shape_cast %8 : vector<128xf32> to vector<128x1xf32>
    %cst_3 = arith.constant 0.00787401571 : f32
    %10 = vector.broadcast %cst_3 : f32 to vector<128x1xf32>
    %11 = arith.mulf %9, %10 : vector<128x1xf32>
    %12 = math.sqrt %11 : vector<128x1xf32>
    %cst_4 = arith.constant 9.99999997E-7 : f32
    %13 = vector.broadcast %cst_4 : f32 to vector<128x1xf32>
    %14 = arith.addf %12, %13 : vector<128x1xf32>
    %15 = tpu.reciprocal %14 {approx = true} : vector<128x1xf32> -> vector<128x1xf32>
    %c0_5 = arith.constant 0 : index
    %16 = memref.load %arg1[%c0_5] : memref<1xf32, #tpu.memory_space<smem>>
    %17 = vector.broadcast %16 : f32 to vector<128x1xf32>
    %18 = arith.mulf %17, %15 : vector<128x1xf32>
    %19 = vector.broadcast %18 : vector<128x1xf32> to vector<128x128xf32>
    %20 = arith.mulf %19, %6 : vector<128x128xf32>
    %c0_6 = arith.constant 0 : index
    %21 = memref.load %arg2[%c0_6] : memref<1xf32, #tpu.memory_space<smem>>
    %22 = vector.broadcast %21 : f32 to vector<128x128xf32>
    %23 = arith.addf %20, %22 : vector<128x128xf32>
    %24 = arith.truncf %23 : vector<128x128xf32> to vector<128x128xbf16>
    %c0_7 = arith.constant 0 : index
    %c0_8 = arith.constant 0 : index
    %25 = vector.load %arg4[%c0_7, %c0_8] : memref<128x128xbf16, #tpu.memory_space<vmem>>, vector<128x128xbf16>
    %cst_9 = arith.constant dense<0.000000e+00> : vector<128x128xf32>
    %26 = tpu.matmul %24, %25, %cst_9 {dimension_numbers = #tpu.dot_dimension_numbers<[1], [0], [0], [1], [0, 0, 1, 1], [], []>} : vector<128x128xbf16>, vector<128x128xbf16>, vector<128x128xf32> -> vector<128x128xf32>
    %c0_10 = arith.constant 0 : index
    %c0_11 = arith.constant 0 : index
    %27 = vector.load %arg3[%c0_10, %c0_11] : memref<128x128xf32, #tpu.memory_space<vmem>>, vector<128x128xf32>
    %28 = arith.addf %27, %26 : vector<128x128xf32>
    %c0_12 = arith.constant 0 : index
    %c0_13 = arith.constant 0 : index
    %29 = vector.load %arg5[%c0_12, %c0_13] : memref<1x128xf32, #tpu.memory_space<vmem>>, vector<1x128xf32>
    %30 = vector.broadcast %29 : vector<1x128xf32> to vector<128x128xf32>
    %31 = arith.addf %28, %30 : vector<128x128xf32>
    %c0_14 = arith.constant 0 : index
    %c0_15 = arith.constant 0 : index
    %32 = vector.load %arg6[%c0_14, %c0_15] : memref<128x128xf32, #tpu.memory_space<vmem>>, vector<128x128xf32>
    tpu.vector_store %arg6[%c0_14, %c0_15], %31 {strides = array<i32>} : memref<128x128xf32, #tpu.memory_space<vmem>>, vector<128x128xf32>,
    return
  }
  func.func @transform_0(%arg0: i32) -> i32 {
    %c0_i32 = arith.constant 0 : i32
    %c0_i32_0 = arith.constant 0 : i32
    return %c0_i32 : i32
  }
  func.func @transform_1(%arg0: i32) -> i32 {
    %c0_i32 = arith.constant 0 : i32
    %c0_i32_0 = arith.constant 0 : i32
    return %c0_i32 : i32
  }
  func.func @transform_2(%arg0: i32) -> (i32, i32) {
    %c0_i32 = arith.constant 0 : i32
    %c0_i32_0 = arith.constant 0 : i32
    return %arg0, %c0_i32 : i32, i32
  }
  func.func @transform_3(%arg0: i32) -> (i32, i32) {
    %c0_i32 = arith.constant 0 : i32
    %c0_i32_0 = arith.constant 0 : i32
    %c0_i32_1 = arith.constant 0 : i32
    return %c0_i32, %c0_i32_0 : i32, i32
  }
  func.func @transform_4(%arg0: i32) -> (i32, i32) {
    %c0_i32 = arith.constant 0 : i32
    %c0_i32_0 = arith.constant 0 : i32
    %c0_i32_1 = arith.constant 0 : i32
    return %c0_i32, %c0_i32_0 : i32, i32
  }
  func.func @transform_5(%arg0: i32) -> (i32, i32) {
    %c0_i32 = arith.constant 0 : i32
    %c0_i32_0 = arith.constant 0 : i32
    return %arg0, %c0_i32 : i32, i32
  }
}

</mosaic_0001>

<bundles_post_ra>
// kernel: tpu_custom_call.1
= control target key start
LH: loop header
LB: loop body
LE: loop exit
PB: predicated region body
PF: predicated region fallthrough
CT: control target
= control target key end

     0   :  { %12 = vsyncpa [#allocation5], 0  ;;  %s1305_s0 = inlined_call_operand.<no memory space> [shape: f32[1], index: 0, kind: input, shape index: {}]   ;;  %s1306_s1 = inlined_call_operand.<no memory space> [shape: f32[1], index: 1, kind: input, shape index: {}]   ;;  %s1307_s2 = inlined_call_operand.hbm [shape: f32[128,128], index: 2, kind: input, shape index: {}]   ;;  %s1308_s3 = inlined_call_operand.hbm [shape: bf16[128,128], index: 3, kind: input, shape index: {}]   ;;  %s1309_s4 = inlined_call_operand.vmem [shape: f32[1,128], index: 4, kind: input, shape index: {}]   ;;  %s1310_s5 = inlined_call_operand.hbm [shape: f32[128,128], index: 5, kind: output, shape index: {}]  }
   0x1   :  { %13 = vsyncpa [#allocation8], 0 }
   0x2   :  { %14 = vsyncpa [#allocation6], 0  ;;  %s853_s18 = smov [#allocation4]  }
   0x3   :  { %s24_s19 = sshll.u32 %s853_s18, 4  ;;  %s25_s19 = int_to_ptr.vmem [resolvable:$true] %s24_s19 }
   0x4   :  { %s795_s20 = scalar_lea.vmem %s25_s19, 2048  ;;  %p800_p1 = scmp.lt.s32.totalorder %s25_s19, %s25_s19 }
   0x5   :  { %p796_p0 = scmp.ne.s32.totalorder %s25_s19, %s795_s20  ;;  %p801_p2 = scmp.lt.s32.totalorder %s795_s20, %s795_s20 }
   0x7   :  { %p802_p3 = por %p801_p2, %p800_p1 }
   0x9   :  { %p803_p4 = pnand %p802_p3, %p796_p0 }
   0xb   :  { %806 = shalt.err (!%p803_p4)
}
   0xc   :  { %s854_s21 = smov 128   ;;  %s855_s22 = smov 8  }
   0xd   :  { %30 = dma.hbm_to_vmem [thread:$0]  %s1307_s2, 2048, %s25_s19, [#allocation5], %s854_s21, %s854_s21, %s855_s22  }
   0xe   :  { %s856_s25 = smov [#allocation7]  }
   0xf   :  { %s36_s26 = sshll.u32 %s856_s25, 4  ;;  %s37_s26 = int_to_ptr.vmem [resolvable:$true] %s36_s26 }
  0x10   :  { %s815_s27 = scalar_lea.vmem %s37_s26, 1024  ;;  %p820_p6 = scmp.lt.s32.totalorder %s37_s26, %s37_s26 }
  0x11   :  { %p816_p5 = scmp.ne.s32.totalorder %s37_s26, %s815_s27  ;;  %p821_p7 = scmp.lt.s32.totalorder %s815_s27, %s815_s27 }
  0x13   :  { %p822_p8 = por %p821_p7, %p820_p6 }
  0x15   :  { %p823_p9 = pnand %p822_p8, %p816_p5 }
  0x17   :  { %826 = shalt.err (!%p823_p9)
}
  0x18   :  { %s857_s28 = smov 64   ;;  %s858_s29 = smov 4  }
  0x19   :  { %42 = dma.hbm_to_vmem [thread:$0]  %s1308_s3, 1024, %s37_s26, [#allocation8], %s857_s28, %s857_s28, %s858_s29  }
  0x1a   :  { %847 = dma.done.wait [#allocation5], 2048  }
  0x1b   :  { %848 = vsyncadd [#allocation5], 4294965248 }
  0x1c   :  { %849 = dma.done.wait [#allocation8], 1024  }
  0x1d   :  { %850 = vsyncadd [#allocation8], 4294966272  ;;  %v899_v0 = vld [vmem:[#allocation4] sm:$0xff]  ;;  %v905_v2 = vld [vmem:[#allocation4 + $0x8] sm:$0xff] }
  0x1e   :  { %v901_v1 = vld [vmem:[#allocation4 + $0x40] sm:$0xff]  ;;  %68 = vadd.xlane.f32.xlu0 %v899_v0  ;;  %v907_v3 = vld [vmem:[#allocation4 + $0x48] sm:$0xff]  ;;  %v909_v4 = vld [vmem:[#allocation4 + $0x10] sm:$0xff] }
  0x1f   :  { %84 = vadd.xlane.f32.xlu1 %v901_v1  ;;  %v913_v5 = vld [vmem:[#allocation4 + $0x18] sm:$0xff]  ;;  %v915_v6 = vld [vmem:[#allocation4 + $0x50] sm:$0xff]  ;;  %v923_v8 = vld [vmem:[#allocation4 + $0x20] sm:$0xff] }
  0x20   :  { %v919_v7 = vld [vmem:[#allocation4 + $0x58] sm:$0xff]  ;;  %v925_v9 = vld [vmem:[#allocation4 + $0x28] sm:$0xff]  ;;  %v929_v10 = vld [vmem:[#allocation4 + $0x60] sm:$0xff] }
  0x21   :  { %v931_v11 = vld [vmem:[#allocation4 + $0x68] sm:$0xff]  ;;  %v935_v12 = vld [vmem:[#allocation4 + $0x30] sm:$0xff]  ;;  %v937_v13 = vld [vmem:[#allocation4 + $0x38] sm:$0xff] }
  0x22   :  { %70 = vadd.xlane.f32.xlu0 %v905_v2  ;;  %1312 = vst [vmem:[#allocation13_spill] sm:$0xff] %v931_v11  ;;  %v941_v14 = vld [vmem:[#allocation4 + $0x70] sm:$0xff]  ;;  %v943_v15 = vld [vmem:[#allocation4 + $0x78] sm:$0xff] }
  0x23   :  { %86 = vadd.xlane.f32.xlu1 %v907_v3 }
  0x26   :  { %72 = vadd.xlane.f32.xlu0 %v909_v4 }
  0x27   :  { %74 = vadd.xlane.f32.xlu1 %v913_v5 }
  0x2a   :  { %88 = vadd.xlane.f32.xlu0 %v915_v6 }
  0x2b   :  { %90 = vadd.xlane.f32.xlu1 %v919_v7 }
  0x2e   :  { %76 = vadd.xlane.f32.xlu0 %v923_v8 }
  0x2f   :  { %78 = vadd.xlane.f32.xlu1 %v925_v9 }
  0x32   :  { %92 = vadd.xlane.f32.xlu0 %v929_v10 }
  0x33   :  { %94 = vadd.xlane.f32.xlu1 %v931_v11 }
  0x36   :  { %80 = vadd.xlane.f32.xlu0 %v935_v12 }
  0x37   :  { %82 = vadd.xlane.f32.xlu1 %v937_v13 }
  0x3a   :  { %96 = vadd.xlane.f32.xlu0 %v941_v14 }
  0x3b   :  { %98 = vadd.xlane.f32.xlu1 %v943_v15 }
  0xa7   :  { %v69_v16 = vpop.xlane.xlu0 %68 }
  0xa8   :  { %v85_v17 = vpop.xlane.xlu1 %84  ;;  %v101_v18 = vmul.f32 0.0078125, %v69_v16 }
  0xa9   :  { %v109_v19 = vmul.f32 0.0078125, %v85_v17 }
  0xaa   :  { %v948_v20 = vsub.f32 %v899_v0, %v101_v18 }
  0xab   :  { %v951_v21 = vsub.f32 %v901_v1, %v109_v19  ;;  %v71_v22 = vpop.xlane.xlu0 %70 }
  0xac   :  { %v87_v23 = vpop.xlane.xlu1 %86  ;;  %v102_v24 = vmul.f32 0.0078125, %v71_v22  ;;  %v133_v25 = vmul.f32 %v948_v20, %v948_v20 }
  0xad   :  { %v110_v26 = vmul.f32 0.0078125, %v87_v23  ;;  %v141_v29 = vmul.f32 %v951_v21, %v951_v21 }
  0xae   :  { %v956_v27 = vsub.f32 %v905_v2, %v102_v24  ;;  %149 = vadd.xlane.f32.xlu0 %v133_v25 }
  0xaf   :  { %v959_v28 = vsub.f32 %v907_v3, %v110_v26  ;;  %v73_v30 = vpop.xlane.xlu0 %72 }
  0xb0   :  { %v75_v31 = vpop.xlane.xlu1 %74  ;;  %v103_v32 = vmul.f32 0.0078125, %v73_v30  ;;  %v134_v33 = vmul.f32 %v956_v27, %v956_v27 }
  0xb1   :  { %v104_v34 = vmul.f32 0.0078125, %v75_v31  ;;  %v142_v37 = vmul.f32 %v959_v28, %v959_v28 }
  0xb2   :  { %v966_v35 = vsub.f32 %v909_v4, %v103_v32  ;;  %165 = vadd.xlane.f32.xlu0 %v141_v29  ;;  %151 = vadd.xlane.f32.xlu1 %v134_v33 }
  0xb3   :  { %v969_v36 = vsub.f32 %v913_v5, %v104_v34  ;;  %v89_v38 = vpop.xlane.xlu0 %88 }
  0xb4   :  { %v91_v39 = vpop.xlane.xlu1 %90  ;;  %v111_v40 = vmul.f32 0.0078125, %v89_v38  ;;  %v135_v41 = vmul.f32 %v966_v35, %v966_v35  ;;  %v715_v38 = vld [vmem:[#allocation7 + $0x38] sm:$0xff]  }
  0xb5   :  { %v112_v42 = vmul.f32 0.0078125, %v91_v39  ;;  %v136_v45 = vmul.f32 %v969_v36, %v969_v36  ;;  %660 = vmatprep.subr.bf16.mxu0 %v715_v38  ;;  %692 = vmatprep.subr.bf16.mxu1 %v715_v38  ;;  %v716_v39 = vld [vmem:[#allocation7 + $0x30] sm:$0xff]  }
  0xb6   :  { %v976_v43 = vsub.f32 %v915_v6, %v111_v40  ;;  %167 = vadd.xlane.f32.xlu1 %v142_v37  ;;  %153 = vadd.xlane.f32.xlu0 %v135_v41  ;;  %v717_v40 = vld [vmem:[#allocation7 + $0x28] sm:$0xff]   ;;  %v718_v41 = vld [vmem:[#allocation7 + $0x20] sm:$0xff]  }
  0xb7   :  { %v979_v44 = vsub.f32 %v919_v7, %v112_v42  ;;  %v77_v46 = vpop.xlane.xlu0 %76  ;;  %661 = vmatpush3.bf16.msra.mxu0 %v715_v38  ;;  %700 = vmatpush3.bf16.msra.mxu1 %v715_v38  ;;  %v719_v42 = vld [vmem:[#allocation7 + $0x18] sm:$0xff]  }
  0xb8   :  { %v79_v47 = vpop.xlane.xlu1 %78  ;;  %v105_v48 = vmul.f32 0.0078125, %v77_v46  ;;  %v143_v49 = vmul.f32 %v976_v43, %v976_v43  ;;  %662 = vmatprep.subr.bf16.mxu0 %v716_v39  ;;  %693 = vmatprep.subr.bf16.mxu1 %v716_v39  ;;  %v721_v46 = vld [vmem:[#allocation7 + $0x8] sm:$0xff]  }
  0xb9   :  { %v106_v50 = vmul.f32 0.0078125, %v79_v47  ;;  %v144_v53 = vmul.f32 %v979_v44, %v979_v44  ;;  %v722_v47 = vld [vmem:[#allocation7] sm:$0xff]  }
  0xba   :  { %v986_v51 = vsub.f32 %v923_v8, %v105_v48  ;;  %155 = vadd.xlane.f32.xlu1 %v136_v45  ;;  %169 = vadd.xlane.f32.xlu0 %v143_v49  ;;  %v720_v45 = vld [vmem:[#allocation7 + $0x10] sm:$0xff]  }
  0xbb   :  { %v989_v52 = vsub.f32 %v925_v9, %v106_v50  ;;  %v93_v54 = vpop.xlane.xlu0 %92  ;;  %663 = vmatpush3.bf16.msra.mxu0 %v716_v39  ;;  %701 = vmatpush3.bf16.msra.mxu1 %v716_v39 }
  0xbc   :  { %v95_v55 = vpop.xlane.xlu1 %94  ;;  %v113_v56 = vmul.f32 0.0078125, %v93_v54  ;;  %v137_v57 = vmul.f32 %v986_v51, %v986_v51  ;;  %664 = vmatprep.subr.bf16.mxu0 %v717_v40  ;;  %694 = vmatprep.subr.bf16.mxu1 %v717_v40 }
  0xbd   :  { %v114_v58 = vmul.f32 0.0078125, %v95_v55  ;;  %v138_v61 = vmul.f32 %v989_v52, %v989_v52 }
  0xbe   :  { %v996_v59 = vsub.f32 %v929_v10, %v113_v56  ;;  %171 = vadd.xlane.f32.xlu1 %v144_v53  ;;  %157 = vadd.xlane.f32.xlu0 %v137_v57 }
  0xbf   :  { %v999_v60 = vsub.f32 %v931_v11, %v114_v58  ;;  %v81_v62 = vpop.xlane.xlu0 %80  ;;  %665 = vmatpush3.bf16.msra.mxu0 %v717_v40  ;;  %702 = vmatpush3.bf16.msra.mxu1 %v717_v40 }
  0xc0   :  { %v83_v63 = vpop.xlane.xlu1 %82  ;;  %v107_v16 = vmul.f32 0.0078125, %v81_v62  ;;  %v145_v17 = vmul.f32 %v996_v59, %v996_v59  ;;  %666 = vmatprep.subr.bf16.mxu0 %v718_v41  ;;  %695 = vmatprep.subr.bf16.mxu1 %v718_v41 }
  0xc1   :  { %v108_v18 = vmul.f32 0.0078125, %v83_v63  ;;  %v146_v23 = vmul.f32 %v999_v60, %v999_v60 }
  0xc2   :  { %v1006_v19 = vsub.f32 %v935_v12, %v107_v16  ;;  %159 = vadd.xlane.f32.xlu1 %v138_v61  ;;  %173 = vadd.xlane.f32.xlu0 %v145_v17 }
  0xc3   :  { %v1009_v22 = vsub.f32 %v937_v13, %v108_v18  ;;  %v97_v24 = vpop.xlane.xlu0 %96  ;;  %667 = vmatpush3.bf16.msra.mxu0 %v718_v41  ;;  %703 = vmatpush3.bf16.msra.mxu1 %v718_v41 }
  0xc4   :  { %v99_v25 = vpop.xlane.xlu1 %98  ;;  %v115_v26 = vmul.f32 0.0078125, %v97_v24  ;;  %v139_v29 = vmul.f32 %v1006_v19, %v1006_v19  ;;  %668 = vmatprep.subr.bf16.mxu0 %v719_v42  ;;  %696 = vmatprep.subr.bf16.mxu1 %v719_v42 }
  0xc5   :  { %v116_v30 = vmul.f32 0.0078125, %v99_v25  ;;  %v140_v33 = vmul.f32 %v1009_v22, %v1009_v22 }
  0xc6   :  { %v1016_v31 = vsub.f32 %v941_v14, %v115_v26  ;;  %175 = vadd.xlane.f32.xlu1 %v146_v23  ;;  %161 = vadd.xlane.f32.xlu0 %v139_v29 }
  0xc7   :  { %v1019_v32 = vsub.f32 %v943_v15, %v116_v30  ;;  %669 = vmatpush3.bf16.msra.mxu0 %v719_v42  ;;  %704 = vmatpush3.bf16.msra.mxu1 %v719_v42 }
  0xc8   :  { %v147_v34 = vmul.f32 %v1016_v31, %v1016_v31  ;;  %670 = vmatprep.subr.bf16.mxu0 %v720_v45  ;;  %697 = vmatprep.subr.bf16.mxu1 %v720_v45 }
  0xc9   :  { %v148_v37 = vmul.f32 %v1019_v32, %v1019_v32 }
  0xca   :  { %163 = vadd.xlane.f32.xlu1 %v140_v33  ;;  %177 = vadd.xlane.f32.xlu0 %v147_v34 }
  0xcb   :  { %671 = vmatpush3.bf16.msra.mxu0 %v720_v45  ;;  %705 = vmatpush3.bf16.msra.mxu1 %v720_v45 }
  0xcc   :  { %672 = vmatprep.subr.bf16.mxu0 %v721_v46  ;;  %698 = vmatprep.subr.bf16.mxu1 %v721_v46 }
  0xce   :  { %179 = vadd.xlane.f32.xlu1 %v148_v37 }
  0xcf   :  { %673 = vmatpush3.bf16.msra.mxu0 %v721_v46  ;;  %706 = vmatpush3.bf16.msra.mxu1 %v721_v46 }
  0xd0   :  { %674 = vmatprep.subr.bf16.mxu0 %v722_v47  ;;  %699 = vmatprep.subr.bf16.mxu1 %v722_v47 }
  0xd3   :  { %675 = vmatpush3.bf16.msra.mxu0 %v722_v47  ;;  %707 = vmatpush3.bf16.msra.mxu1 %v722_v47 }
 0x137   :  { %v150_v48 = vpop.xlane.xlu0 %149 }
 0x138   :  { %v181_v49 = vmul.f32 0.007874016, %v150_v48 }
 0x13a   :  { %723 = vrsqrt.f32 %v181_v49  ;;  %vm199_vm0 = vcmp.eq.f32.partialorder %v181_v49, inf  ;;  %vm201_vm1 = vcmp.eq.f32.partialorder %v181_v49, 0.0  ;;  %v202_v30 = vand.u32 2147483648, %v181_v49 }
 0x13b   :  { %v152_v50 = vpop.xlane.xlu1 %151  ;;  %v166_v53 = vpop.xlane.xlu0 %165 }
 0x13c   :  { %v1027_v54 = vmul.f32 0.007874016, %v152_v50  ;;  %v1029_v55 = vmul.f32 0.007874016, %v166_v53 }
 0x13e   :  { %725 = vrsqrt.f32 %v1027_v54  ;;  %vm206_vm2 = vcmp.eq.f32.partialorder %v1027_v54, inf  ;;  %vm255_vm3 = vcmp.eq.f32.partialorder %v1029_v55, inf  ;;  %vm208_vm4 = vcmp.eq.f32.partialorder %v1027_v54, 0.0 }
 0x13f   :  { %v168_v56 = vpop.xlane.xlu1 %167  ;;  %v154_v57 = vpop.xlane.xlu0 %153  ;;  %727 = vrsqrt.f32 %v1029_v55  ;;  %vm257_vm13 = vcmp.eq.f32.partialorder %v1029_v55, 0.0 }
 0x140   :  { %v1033_v58 = vmul.f32 0.007874016, %v154_v57  ;;  %v1035_v61 = vmul.f32 0.007874016, %v168_v56 }
 0x142   :  { %729 = vrsqrt.f32 %v1033_v58  ;;  %vm213_vm5 = vcmp.eq.f32.partialorder %v1033_v58, inf  ;;  %vm215_vm6 = vcmp.eq.f32.partialorder %v1033_v58, 0.0  ;;  %v216_v47 = vand.u32 2147483648, %v1033_v58 }
 0x143   :  { %v156_v62 = vpop.xlane.xlu1 %155  ;;  %v170_v63 = vpop.xlane.xlu0 %169  ;;  %731 = vrsqrt.f32 %v1035_v61  ;;  %vm262_vm11 = vcmp.eq.f32.partialorder %v1035_v61, inf }
 0x144   :  { %v1038_v16 = vmul.f32 0.007874016, %v156_v62  ;;  %v1040_v17 = vmul.f32 0.007874016, %v170_v63 }
 0x146   :  { %733 = vrsqrt.f32 %v1038_v16  ;;  %vm220_vm7 = vcmp.eq.f32.partialorder %v1038_v16, inf  ;;  %vm222_vm8 = vcmp.eq.f32.partialorder %v1038_v16, 0.0  ;;  %v223_v50 = vand.u32 2147483648, %v1038_v16 }
 0x147   :  { %v724_v18 = vpop.eup %723  ;;  %735 = vrsqrt.f32 %v1040_v17  ;;  %v172_v23 = vpop.xlane.xlu1 %171  ;;  %vm269_vm9 = vcmp.eq.f32.partialorder %v1040_v17, inf  ;;  %vm271_vm10 = vcmp.eq.f32.partialorder %v1040_v17, 0.0 }
 0x148   :  { %v158_v24 = vpop.xlane.xlu0 %157  ;;  %v198_v25 = vmul.f32 %v724_v18, %v181_v49  ;;  %v1045_v26 = vmul.f32 0.007874016, %v172_v23 }
 0x149   :  { %v1047_v29 = vmul.f32 0.007874016, %v158_v24  ;;  %v272_v24 = vand.u32 2147483648, %v1040_v17 }
 0x14a   :  { %737 = vrsqrt.f32 %v1045_v26  ;;  %v200_v39 = vsel %vm199_vm0, %v181_v49, %v198_v25  ;;  %vm276_vm12 = vcmp.eq.f32.partialorder %v1045_v26, inf  ;;  %vm278_vm14 = vcmp.eq.f32.partialorder %v1045_v26, 0.0 }
 0x14b   :  { %739 = vrsqrt.f32 %v1047_v29  ;;  %v160_v34 = vpop.xlane.xlu1 %159  ;;  %v726_v38 = vpop.eup %725  ;;  %v203_v57 = vsel %vm201_vm1, %v202_v30, %v200_v39  ;;  %v279_v30 = vand.u32 2147483648, %v1045_v26  ;;  %vm227_vm15 = vcmp.eq.f32.partialorder %v1047_v29, inf }
 0x14c   :  { %v174_v37 = vpop.xlane.xlu0 %173  ;;  %v1054_v40 = vmul.f32 0.007874016, %v160_v34  ;;  %v728_v42 = vpop.eup %727  ;;  %v205_v48 = vmul.f32 %v726_v38, %v1027_v54  ;;  %v309_v34 = vadd.f32 1e-06, %v203_v57  ;;  %vm229_vm0 = vcmp.eq.f32.partialorder %v1047_v29, 0.0 }
 0x14d   :  { %v1056_v41 = vmul.f32 0.007874016, %v174_v37  ;;  %v254_v63 = vmul.f32 %v728_v42, %v1029_v55  ;;  %vm264_vm1 = vcmp.eq.f32.partialorder %v1035_v61, 0.0 }
 0x14e   :  { %741 = vrsqrt.f32 %v1054_v40  ;;  %v207_v38 = vsel %vm206_vm2, %v1027_v54, %v205_v48  ;;  %v230_v48 = vand.u32 2147483648, %v1047_v29  ;;  %vm234_vm2 = vcmp.eq.f32.partialorder %v1054_v40, inf }
 0x14f   :  { %743 = vrsqrt.f32 %v1056_v41  ;;  %v176_v53 = vpop.xlane.xlu1 %175  ;;  %v730_v62 = vpop.eup %729  ;;  %v237_v33 = vand.u32 2147483648, %v1054_v40 }
 0x150   :  { %v162_v56 = vpop.xlane.xlu0 %161  ;;  %v1074_v18 = vmul.f32 0.007874016, %v176_v53  ;;  %v212_v23 = vmul.f32 %v730_v62, %v1033_v58  ;;  %v732_v49 = vpop.eup %731 }
 0x151   :  { %v1080_v25 = vmul.f32 0.007874016, %v162_v56  ;;  %v256_v56 = vsel %vm255_vm3, %v1029_v55, %v254_v63  ;;  %v261_v63 = vmul.f32 %v732_v49, %v1035_v61  ;;  %vm236_vm3 = vcmp.eq.f32.partialorder %v1054_v40, 0.0 }
 0x152   :  { %745 = vrsqrt.f32 %v1074_v18  ;;  %v214_v39 = vsel %vm213_vm5, %v1033_v58, %v212_v23  ;;  %vm283_vm5 = vcmp.eq.f32.partialorder %v1056_v41, inf }
 0x153   :  { %v734_v37 = vpop.eup %733  ;;  %747 = vrsqrt.f32 %v1080_v25  ;;  %v164_v42 = vpop.xlane.xlu1 %163  ;;  %v217_v57 = vsel %vm215_vm6, %v216_v47, %v214_v39  ;;  %v1313_v47 = vand.u32 2147483648, %v1027_v54  ;;  %vm285_vm6 = vcmp.eq.f32.partialorder %v1056_v41, 0.0 }
 0x154   :  { %v736_v53 = vpop.eup %735  ;;  %v219_v62 = vmul.f32 %v734_v37, %v1038_v16  ;;  %v178_v46 = vpop.xlane.xlu0 %177  ;;  %v311_v23 = vadd.f32 1e-06, %v217_v57  ;;  %v1106_v11 = vmul.f32 0.007874016, %v164_v42  ;;  %749 = vrcp.f32 %v309_v34 }
 0x155   :  { %v268_v45 = vmul.f32 %v736_v53, %v1040_v17  ;;  %v210_v37 = vsel %vm208_vm4, %v1313_v47, %v207_v38  ;;  %v1124_v53 = vmul.f32 0.007874016, %v178_v46  ;;  %vm290_vm4 = vcmp.eq.f32.partialorder %v1074_v18, inf }
 0x156   :  { %v221_v58 = vsel %vm220_vm7, %v1038_v16, %v219_v62  ;;  %751 = vrcp.f32 %v311_v23  ;;  %v310_v23 = vadd.f32 1e-06, %v210_v37  ;;  %v1314_v37 = vand.u32 2147483648, %v1029_v55 }
 0x157   :  { %v738_v39 = vpop.eup %737  ;;  %v224_v42 = vsel %vm222_vm8, %v223_v50, %v221_v58  ;;  %v270_v49 = vsel %vm269_vm9, %v1040_v17, %v268_v45  ;;  %753 = vrsqrt.f32 %v1106_v11  ;;  %v286_v50 = vand.u32 2147483648, %v1056_v41  ;;  %v180_v46 = vpop.xlane.xlu1 %179 }
 0x158   :  { %v740_v57 = vpop.eup %739  ;;  %v312_v62 = vadd.f32 1e-06, %v224_v42  ;;  %v273_v54 = vsel %vm271_vm10, %v272_v24, %v270_v49  ;;  %v275_v34 = vmul.f32 %v738_v39, %v1045_v26  ;;  %v263_v45 = vsel %vm262_vm11, %v1035_v61, %v261_v63 }
 0x159   :  { %v319_v38 = vadd.f32 1e-06, %v273_v54  ;;  %v226_v16 = vmul.f32 %v740_v57, %v1047_v29  ;;  %v259_v63 = vsel %vm257_vm13, %v1314_v37, %v256_v56  ;;  %vm292_vm7 = vcmp.eq.f32.partialorder %v1074_v18, 0.0 }
 0x15a   :  { %755 = vrcp.f32 %v312_v62  ;;  %v277_v17 = vsel %vm276_vm12, %v1045_v26, %v275_v34  ;;  %v1153_v62 = vmul.f32 0.007874016, %v180_v46  ;;  %vm241_vm8 = vcmp.eq.f32.partialorder %v1080_v25, inf }
 0x15b   :  { %v742_v24 = vpop.eup %741  ;;  %757 = vrcp.f32 %v319_v38  ;;  %v280_v58 = vsel %vm278_vm14, %v279_v30, %v277_v17  ;;  %v228_v47 = vsel %vm227_vm15, %v1047_v29, %v226_v16  ;;  %v1315_v29 = vand.u32 2147483648, %v1035_v61 }
 0x15c   :  { %v744_v39 = vpop.eup %743  ;;  %v320_v42 = vadd.f32 1e-06, %v280_v58  ;;  %v231_v49 = vsel %vm229_vm0, %v230_v48, %v228_v47  ;;  %v233_v57 = vmul.f32 %v742_v24, %v1054_v40  ;;  %759 = vrsqrt.f32 %v1124_v53 }
 0x15d   :  { %v313_v26 = vadd.f32 1e-06, %v231_v49  ;;  %v282_v30 = vmul.f32 %v744_v39, %v1056_v41  ;;  %761 = vrcp.f32 %v310_v23  ;;  %v266_v56 = vsel %vm264_vm1, %v1315_v29, %v263_v45 }
 0x15e   :  { %763 = vrcp.f32 %v320_v42  ;;  %v235_v55 = vsel %vm234_vm2, %v1054_v40, %v233_v57  ;;  %v317_v38 = vadd.f32 1e-06, %v259_v63  ;;  %v293_v45 = vand.u32 2147483648, %v1074_v18 }
 0x15f   :  { %v746_v48 = vpop.eup %745  ;;  %765 = vrcp.f32 %v313_v26  ;;  %v238_v54 = vsel %vm236_vm3, %v237_v33, %v235_v55  ;;  %v284_v34 = vsel %vm283_vm5, %v1056_v41, %v282_v30  ;;  %v244_v24 = vand.u32 2147483648, %v1080_v25 }
 0x160   :  { %v748_v16 = vpop.eup %747  ;;  %v314_v23 = vadd.f32 1e-06, %v238_v54  ;;  %v287_v17 = vsel %vm285_vm6, %v286_v50, %v284_v34  ;;  %v289_v46 = vmul.f32 %v746_v48, %v1074_v18  ;;  %767 = vrsqrt.f32 %v1153_v62 }
 0x161   :  { %v321_v61 = vadd.f32 1e-06, %v287_v17  ;;  %v240_v40 = vmul.f32 %v748_v16, %v1080_v25  ;;  %v318_v41 = vadd.f32 1e-06, %v266_v56  ;;  %v750_v50 = vpop.eup %749  ;;  %vm243_vm9 = vcmp.eq.f32.partialorder %v1080_v25, 0.0 }
 0x162   :  { %769 = vrcp.f32 %v314_v23  ;;  %v291_v33 = vsel %vm290_vm4, %v1074_v18, %v289_v46  ;;  %v1186_v42 = vstv %s1305_s0  ;;  %vm248_vm10 = vcmp.eq.f32.partialorder %v1106_v11, inf }
 0x163   :  { %771 = vrcp.f32 %v321_v61  ;;  %v294_v58 = vsel %vm292_vm7, %v293_v45, %v291_v33  ;;  %v242_v47 = vsel %vm241_vm8, %v1080_v25, %v240_v40  ;;  %v752_v37 = vpop.eup %751  ;;  %v251_v25 = vand.u32 2147483648, %v1106_v11 }
 0x164   :  { %v322_v63 = vadd.f32 1e-06, %v294_v58  ;;  %v245_v39 = vsel %vm243_vm9, %v244_v24, %v242_v47  ;;  %773 = vrcp.f32 %v317_v38  ;;  %v754_v49 = vpop.eup %753  ;;  %v345_v26 = vmul.f32 %v752_v37, %v1186_v42 }
 0x165   :  { %v315_v57 = vadd.f32 1e-06, %v245_v39  ;;  %775 = vrcp.f32 %v318_v41  ;;  %v247_v18 = vmul.f32 %v754_v49, %v1106_v11  ;;  %v343_v55 = vmul.f32 %v750_v50, %v1186_v42 }
 0x166   :  { %777 = vrcp.f32 %v322_v63  ;;  %vm250_vm11 = vcmp.eq.f32.partialorder %v1106_v11, 0.0  ;;  %v1198_v48 = vstv %s1306_s1  ;;  %vm297_vm12 = vcmp.eq.f32.partialorder %v1124_v53, inf }
 0x167   :  { %v756_v30 = vpop.eup %755  ;;  %779 = vrcp.f32 %v315_v57  ;;  %v249_v56 = vsel %vm248_vm10, %v1106_v11, %v247_v18  ;;  %vm299_vm13 = vcmp.eq.f32.partialorder %v1124_v53, 0.0  ;;  %v300_v16 = vand.u32 2147483648, %v1124_v53 }
 0x168   :  { %v758_v29 = vpop.eup %757  ;;  %v346_v54 = vmul.f32 %v756_v30, %v1186_v42  ;;  %v252_v38 = vsel %vm250_vm11, %v251_v25, %v249_v56  ;;  %v361_v11 = vmul.f32 %v345_v26, %v966_v35  ;;  %vm304_vm14 = vcmp.eq.f32.partialorder %v1153_v62, inf }
 0x169   :  { %v760_v34 = vpop.eup %759  ;;  %v316_v17 = vadd.f32 1e-06, %v252_v38  ;;  %vm306_vm15 = vcmp.eq.f32.partialorder %v1153_v62, 0.0  ;;  %v359_v33 = vmul.f32 %v343_v55, %v948_v20  ;;  %v307_v47 = vand.u32 2147483648, %v1153_v62 }
 0x16a   :  { %v762_v23 = vpop.eup %761  ;;  %v296_v46 = vmul.f32 %v760_v34, %v1124_v53  ;;  %v362_v61 = vmul.f32 %v346_v54, %v969_v36  ;;  %v379_v49 = vadd.f32 %v1198_v48, %v361_v11  ;;  %v353_v57 = vmul.f32 %v758_v29, %v1186_v42 }
 0x16b   :  { %v764_v45 = vpop.eup %763  ;;  %v344_v40 = vmul.f32 %v762_v23, %v1186_v42  ;;  %781 = vrcp.f32 %v316_v17  ;;  %v377_v26 = vadd.f32 %v1198_v48, %v359_v33 }
 0x16c   :  { %v766_v24 = vpop.eup %765  ;;  %v298_v41 = vsel %vm297_vm12, %v1124_v53, %v296_v46  ;;  %v380_v50 = vadd.f32 %v1198_v48, %v362_v61  ;;  %v354_v58 = vmul.f32 %v764_v45, %v1186_v42  ;;  %v369_v17 = vmul.f32 %v353_v57, %v976_v43 }
 0x16d   :  { %v768_v35 = vpop.eup %767  ;;  %v301_v36 = vsel %vm299_vm13, %v300_v16, %v298_v41  ;;  %v360_v37 = vmul.f32 %v344_v40, %v956_v27  ;;  %v347_v63 = vmul.f32 %v766_v24, %v1186_v42 }
 0x16e   :  { %v323_v39 = vadd.f32 1e-06, %v301_v36  ;;  %v303_v20 = vmul.f32 %v768_v35, %v1153_v62  ;;  %v370_v53 = vmul.f32 %v354_v58, %v979_v44  ;;  %v394_v56 = vpack.c.bf16 %v380_v50, %v379_v49 }
 0x16f   :  { %v770_v18 = vpop.eup %769  ;;  %v378_v30 = vadd.f32 %v1198_v48, %v360_v37  ;;  %v363_v25 = vmul.f32 %v347_v63, %v986_v51  ;;  %v387_v50 = vadd.f32 %v1198_v48, %v369_v17 }
 0x170   :  { %v772_v55 = vpop.eup %771  ;;  %783 = vrcp.f32 %v323_v39  ;;  %v305_v27 = vsel %vm304_vm14, %v1153_v62, %v303_v20  ;;  %v348_v54 = vmul.f32 %v770_v18, %v1186_v42  ;;  %v388_v45 = vadd.f32 %v1198_v48, %v370_v53 }
 0x171   :  { %v774_v34 = vpop.eup %773  ;;  %v308_v29 = vsel %vm306_vm15, %v307_v47, %v305_v27  ;;  %v393_v38 = vpack.c.bf16 %v378_v30, %v377_v26  ;;  %v355_v16 = vmul.f32 %v772_v55, %v1186_v42  ;;  %v381_v62 = vadd.f32 %v1198_v48, %v363_v25 }
 0x172   :  { %v776_v23 = vpop.eup %775  ;;  %v324_v44 = vadd.f32 1e-06, %v308_v29  ;;  %v351_v51 = vmul.f32 %v774_v34, %v1186_v42  ;;  %v364_v46 = vmul.f32 %v348_v54, %v989_v52  ;;  %v398_v37 = vpack.c.bf16 %v388_v45, %v387_v50 }
 0x173   :  { %v778_v11 = vpop.eup %777  ;;  %676 = vmatprep.mubr.bf16.mxu0 %v393_v38  ;;  %v352_v61 = vmul.f32 %v776_v23, %v1186_v42  ;;  %v371_v40 = vmul.f32 %v355_v16, %v996_v59  ;;  %v1265_v38 = vld [vmem:[%s1309_s4] ss:$0 sm:$0xff]  ;;  %s859_s4 = smov [#allocation9]  }
 0x174   :  { %v780_v33 = vpop.eup %779  ;;  %785 = vrcp.f32 %v324_v44  ;;  %v367_v24 = vmul.f32 %v351_v51, %v951_v21  ;;  %677 = vmatmul.mubr.bf16.vlgmr.msra.gmra.mxu0 %v394_v56  ;;  %v382_v41 = vadd.f32 %v1198_v48, %v364_v46  ;;  %v356_v43 = vmul.f32 %v778_v11, %v1186_v42  ;;  %s622_s9 = sshll.u32 %s859_s4, 4  ;;  %s623_s9 = int_to_ptr.vmem [resolvable:$true] %s622_s9 }
 0x175   :  { %v368_v52 = vmul.f32 %v352_v61, %v959_v28  ;;  %v349_v36 = vmul.f32 %v780_v33, %v1186_v42  ;;  %v389_v21 = vadd.f32 %v1198_v48, %v371_v40  ;;  %s827_s10 = scalar_lea.vmem %s623_s9, 2048  ;;  %p832_p11 = scmp.lt.s32.totalorder %s623_s9, %s623_s9 }
 0x176   :  { %v395_v58 = vpack.c.bf16 %v382_v41, %v381_v62  ;;  %v372_v35 = vmul.f32 %v356_v43, %v999_v60  ;;  %v385_v59 = vadd.f32 %v1198_v48, %v367_v24  ;;  %p828_p10 = scmp.ne.s32.totalorder %s623_s9, %s827_s10  ;;  %p833_p12 = scmp.lt.s32.totalorder %s827_s10, %s827_s10 }
 0x177   :  { %v386_v47 = vadd.f32 %v1198_v48, %v368_v52  ;;  %v365_v57 = vmul.f32 %v349_v36, %v1006_v19 }
 0x178   :  { %680 = vmatprep.mubr.bf16.mxu0 %v395_v58  ;;  %v390_v63 = vadd.f32 %v1198_v48, %v372_v35  ;;  %v782_v39 = vpop.eup %781  ;;  %p834_p13 = por %p833_p12, %p832_p11 }
 0x179   :  { %v397_v20 = vpack.c.bf16 %v386_v47, %v385_v59  ;;  %v350_v49 = vmul.f32 %v782_v39, %v1186_v42  ;;  %v383_v26 = vadd.f32 %v1198_v48, %v365_v57 }
 0x17a   :  { %v399_v28 = vpack.c.bf16 %v390_v63, %v389_v21  ;;  %p835_p0 = pnand %p834_p13, %p828_p10 }
 0x17b   :  { %684 = vmatprep.mubr.bf16.mxu1 %v397_v20  ;;  %v366_v60 = vmul.f32 %v350_v49, %v1009_v22 }
 0x17c   :  { %685 = vmatmul.mubr.bf16.vlgmr.msra.gmra.mxu1 %v398_v37 }
 0x17d   :  { %v784_v18 = vpop.eup %783  ;;  %688 = vmatprep.mubr.bf16.mxu1 %v399_v28  ;;  %v384_v30 = vadd.f32 %v1198_v48, %v366_v60 }
 0x17e   :  { %v357_v53 = vmul.f32 %v784_v18, %v1186_v42 }
 0x17f   :  { %v396_v25 = vpack.c.bf16 %v384_v30, %v383_v26 }
 0x180   :  { %v373_v56 = vmul.f32 %v357_v53, %v1016_v31 }
 0x181   :  { %v786_v55 = vpop.eup %785  ;;  %681 = vmatmul.mubr.bf16.gmra.mxu0 %v396_v25 }
 0x182   :  { %v358_v27 = vmul.f32 %v786_v55, %v1186_v42  ;;  %v391_v54 = vadd.f32 %v1198_v48, %v373_v56 }
 0x184   :  { %v374_v19 = vmul.f32 %v358_v27, %v1019_v32 }
 0x186   :  { %v392_v22 = vadd.f32 %v1198_v48, %v374_v19 }
 0x188   :  { %v400_v34 = vpack.c.bf16 %v392_v22, %v391_v54 }
 0x18a   :  { %689 = vmatmul.mubr.bf16.gmra.mxu1 %v400_v34 }
 0x234   :  { %v678_v29 = vpop.f32.mrf.mxu0 }
 0x235   :  { %v564_v16 = vadd.f32 %v678_v29, %v909_v4 }
 0x236   :  { %v499_v23 = vpop.f32.mrf.mxu0 }
 0x237   :  { %v587_v42 = vadd.f32 %v1265_v38, %v564_v16  ;;  %v562_v31 = vadd.f32 %v499_v23, %v899_v0 }
 0x238   :  { %v679_v32 = vpop.f32.mrf.mxu0 }
 0x239   :  { %603 = vst [vmem:[#allocation9 + $0x10] sm:$0xff] %v587_v42  ;;  %v585_v44 = vadd.f32 %v1265_v38, %v562_v31  ;;  %v565_v48 = vadd.f32 %v679_v32, %v913_v5 }
 0x23a   :  { %v502_v51 = vpop.f32.mrf.mxu0 }
 0x23b   :  { %601 = vst [vmem:[#allocation9] sm:$0xff] %v585_v44  ;;  %v588_v17 = vadd.f32 %v1265_v38, %v565_v48  ;;  %v563_v46 = vadd.f32 %v502_v51, %v905_v2 }
 0x23c   :  { %v686_v11 = vpop.f32.mrf.mxu1 }
 0x23d   :  { %604 = vst [vmem:[#allocation9 + $0x18] sm:$0xff] %v588_v17  ;;  %v572_v4 = vadd.f32 %v686_v11, %v915_v6  ;;  %v586_v61 = vadd.f32 %v1265_v38, %v563_v46 }
 0x23e   :  { %v531_v45 = vpop.f32.mrf.mxu1 }
 0x23f   :  { %v595_v0 = vadd.f32 %v1265_v38, %v572_v4  ;;  %602 = vst [vmem:[#allocation9 + $0x8] sm:$0xff] %v586_v61  ;;  %v570_v62 = vadd.f32 %v531_v45, %v901_v1 }
 0x240   :  { %v687_v40 = vpop.f32.mrf.mxu1 }
 0x241   :  { %611 = vst [vmem:[#allocation9 + $0x50] sm:$0xff] %v595_v0  ;;  %v593_v5 = vadd.f32 %v1265_v38, %v570_v62  ;;  %v573_v33 = vadd.f32 %v687_v40, %v919_v7  ;;  %v682_v2 = vpop.f32.mrf.mxu0 }
 0x242   :  { %v534_v24 = vpop.f32.mrf.mxu1  ;;  %v568_v43 = vadd.f32 %v682_v2, %v935_v12 }
 0x243   :  { %609 = vst [vmem:[#allocation9 + $0x40] sm:$0xff] %v593_v5  ;;  %v596_v41 = vadd.f32 %v1265_v38, %v573_v33  ;;  %v571_v6 = vadd.f32 %v534_v24, %v907_v3  ;;  %v515_v52 = vpop.f32.mrf.mxu0 }
 0x244   :  { %v591_v1 = vadd.f32 %v1265_v38, %v568_v43  ;;  %v566_v58 = vadd.f32 %v515_v52, %v923_v8 }
 0x245   :  { %612 = vst [vmem:[#allocation9 + $0x58] sm:$0xff] %v596_v41  ;;  %v594_v50 = vadd.f32 %v1265_v38, %v571_v6  ;;  %v683_v35 = vpop.f32.mrf.mxu0 }
 0x246   :  { %607 = vst [vmem:[#allocation9 + $0x30] sm:$0xff] %v591_v1  ;;  %v589_v7 = vadd.f32 %v1265_v38, %v566_v58  ;;  %v569_v36 = vadd.f32 %v683_v35, %v937_v13 }
 0x247   :  { %610 = vst [vmem:[#allocation9 + $0x48] sm:$0xff] %v594_v50  ;;  %v518_v59 = vpop.f32.mrf.mxu0 }
 0x248   :  { %605 = vst [vmem:[#allocation9 + $0x20] sm:$0xff] %v589_v7  ;;  %v592_v3 = vadd.f32 %v1265_v38, %v569_v36  ;;  %v567_v12 = vadd.f32 %v518_v59, %v925_v9 }
 0x24a   :  { %v690_v47 = vpop.f32.mrf.mxu1  ;;  %608 = vst [vmem:[#allocation9 + $0x38] sm:$0xff] %v592_v3  ;;  %v590_v21 = vadd.f32 %v1265_v38, %v567_v12 }
 0x24b   :  { %v576_v37 = vadd.f32 %v690_v47, %v941_v14  ;;  %v1316_v14 = vld [vmem:[#allocation13_spill] sm:$0xff] }
 0x24c   :  { %v547_v8 = vpop.f32.mrf.mxu1  ;;  %606 = vst [vmem:[#allocation9 + $0x28] sm:$0xff] %v590_v21 }
 0x24d   :  { %v599_v63 = vadd.f32 %v1265_v38, %v576_v37  ;;  %v574_v39 = vadd.f32 %v547_v8, %v929_v10 }
 0x24e   :  { %v691_v20 = vpop.f32.mrf.mxu1 }
 0x24f   :  { %615 = vst [vmem:[#allocation9 + $0x70] sm:$0xff] %v599_v63  ;;  %v597_v13 = vadd.f32 %v1265_v38, %v574_v39  ;;  %v577_v28 = vadd.f32 %v691_v20, %v943_v15 }
 0x250   :  { %v550_v49 = vpop.f32.mrf.mxu1 }
 0x251   :  { %613 = vst [vmem:[#allocation9 + $0x60] sm:$0xff] %v597_v13  ;;  %v600_v9 = vadd.f32 %v1265_v38, %v577_v28  ;;  %v575_v57 = vadd.f32 %v550_v49, %v1316_v14 }
 0x253   :  { %616 = vst [vmem:[#allocation9 + $0x78] sm:$0xff] %v600_v9  ;;  %v598_v60 = vadd.f32 %v1265_v38, %v575_v57 }
 0x255   :  { %614 = vst [vmem:[#allocation9 + $0x68] sm:$0xff] %v598_v60 }
 0x256   :  { %838 = shalt.err (!%p835_p0)
}
 0x257   :  { %628 = dma.vmem_to_hbm [thread:$0]  %s623_s9, 2048, %s1310_s5, [#allocation6], %s854_s21, %s854_s21, %s855_s22  }
 0x258   :  { %851 = dma.done.wait [#allocation6], 2048  }
 0x259   :  { %852 = vsyncadd [#allocation6], 4294965248 }
 0x25a   :  { %632 = vsyncpa [#allocation5], 1 }
 0x25b   :  { %633 = vsyncpa [#allocation8], 1 }
 0x25c   :  { %634 = vsyncpa [#allocation6], 1 }

// kernel: tpu_custom_call.1
= control target key start
LH: loop header
LB: loop body
LE: loop exit
PB: predicated region body
PF: predicated region fallthrough
CT: control target
= control target key end

     0   :  { %12 = vsyncpa [#allocation5], 0  ;;  %s1305_s0 = inlined_call_operand.<no memory space> [shape: f32[1], index: 0, kind: input, shape index: {}]   ;;  %s1306_s1 = inlined_call_operand.<no memory space> [shape: f32[1], index: 1, kind: input, shape index: {}]   ;;  %s1307_s2 = inlined_call_operand.hbm [shape: f32[128,128], index: 2, kind: input, shape index: {}]   ;;  %s1308_s3 = inlined_call_operand.hbm [shape: bf16[128,128], index: 3, kind: input, shape index: {}]   ;;  %s1309_s4 = inlined_call_operand.vmem [shape: f32[1,128], index: 4, kind: input, shape index: {}]   ;;  %s1310_s5 = inlined_call_operand.hbm [shape: f32[128,128], index: 5, kind: output, shape index: {}]  }
   0x1   :  { %13 = vsyncpa [#allocation8], 0 }
   0x2   :  { %14 = vsyncpa [#allocation6], 0  ;;  %s853_s18 = smov [#allocation4]  }
   0x3   :  { %s24_s19 = sshll.u32 %s853_s18, 4  ;;  %s25_s19 = int_to_ptr.vmem [resolvable:$true] %s24_s19 }
   0x4   :  { %s795_s20 = scalar_lea.vmem %s25_s19, 2048  ;;  %p800_p1 = scmp.lt.s32.totalorder %s25_s19, %s25_s19 }
   0x5   :  { %p796_p0 = scmp.ne.s32.totalorder %s25_s19, %s795_s20  ;;  %p801_p2 = scmp.lt.s32.totalorder %s795_s20, %s795_s20 }
   0x7   :  { %p802_p3 = por %p801_p2, %p800_p1 }
   0x9   :  { %p803_p4 = pnand %p802_p3, %p796_p0 }
   0xb   :  { %806 = shalt.err (!%p803_p4)
}
   0xc   :  { %s854_s21 = smov 128   ;;  %s855_s22 = smov 8  }
   0xd   :  { %30 = dma.hbm_to_vmem [thread:$0]  %s1307_s2, 2048, %s25_s19, [#allocation5], %s854_s21, %s854_s21, %s855_s22  }
   0xe   :  { %s856_s25 = smov [#allocation7]  }
   0xf   :  { %s36_s26 = sshll.u32 %s856_s25, 4  ;;  %s37_s26 = int_to_ptr.vmem [resolvable:$true] %s36_s26 }
  0x10   :  { %s815_s27 = scalar_lea.vmem %s37_s26, 1024  ;;  %p820_p6 = scmp.lt.s32.totalorder %s37_s26, %s37_s26 }
  0x11   :  { %p816_p5 = scmp.ne.s32.totalorder %s37_s26, %s815_s27  ;;  %p821_p7 = scmp.lt.s32.totalorder %s815_s27, %s815_s27 }
  0x13   :  { %p822_p8 = por %p821_p7, %p820_p6 }
  0x15   :  { %p823_p9 = pnand %p822_p8, %p816_p5 }
  0x17   :  { %826 = shalt.err (!%p823_p9)
}
  0x18   :  { %s857_s28 = smov 64   ;;  %s858_s29 = smov 4  }
  0x19   :  { %42 = dma.hbm_to_vmem [thread:$0]  %s1308_s3, 1024, %s37_s26, [#allocation8], %s857_s28, %s857_s28, %s858_s29  }
  0x1a   :  { %847 = dma.done.wait [#allocation5], 2048  }
  0x1b   :  { %848 = vsyncadd [#allocation5], 4294965248 }
  0x1c   :  { %849 = dma.done.wait [#allocation8], 1024  }
  0x1d   :  { %850 = vsyncadd [#allocation8], 4294966272  ;;  %v899_v0 = vld [vmem:[#allocation4] sm:$0xff]  ;;  %v905_v2 = vld [vmem:[#allocation4 + $0x8] sm:$0xff] }
  0x1e   :  { %v901_v1 = vld [vmem:[#allocation4 + $0x40] sm:$0xff]  ;;  %68 = vadd.xlane.f32.xlu0 %v899_v0  ;;  %v907_v3 = vld [vmem:[#allocation4 + $0x48] sm:$0xff]  ;;  %v909_v4 = vld [vmem:[#allocation4 + $0x10] sm:$0xff] }
  0x1f   :  { %84 = vadd.xlane.f32.xlu1 %v901_v1  ;;  %v913_v5 = vld [vmem:[#allocation4 + $0x18] sm:$0xff]  ;;  %v915_v6 = vld [vmem:[#allocation4 + $0x50] sm:$0xff]  ;;  %v923_v8 = vld [vmem:[#allocation4 + $0x20] sm:$0xff] }
  0x20   :  { %v919_v7 = vld [vmem:[#allocation4 + $0x58] sm:$0xff]  ;;  %v925_v9 = vld [vmem:[#allocation4 + $0x28] sm:$0xff]  ;;  %v929_v10 = vld [vmem:[#allocation4 + $0x60] sm:$0xff] }
  0x21   :  { %v931_v11 = vld [vmem:[#allocation4 + $0x68] sm:$0xff]  ;;  %v935_v12 = vld [vmem:[#allocation4 + $0x30] sm:$0xff]  ;;  %v937_v13 = vld [vmem:[#allocation4 + $0x38] sm:$0xff] }
  0x22   :  { %70 = vadd.xlane.f32.xlu0 %v905_v2  ;;  %1312 = vst [vmem:[#allocation13_spill] sm:$0xff] %v931_v11  ;;  %v941_v14 = vld [vmem:[#allocation4 + $0x70] sm:$0xff]  ;;  %v943_v15 = vld [vmem:[#allocation4 + $0x78] sm:$0xff] }
  0x23   :  { %86 = vadd.xlane.f32.xlu1 %v907_v3 }
  0x26   :  { %72 = vadd.xlane.f32.xlu0 %v909_v4 }
  0x27   :  { %74 = vadd.xlane.f32.xlu1 %v913_v5 }
  0x2a   :  { %88 = vadd.xlane.f32.xlu0 %v915_v6 }
  0x2b   :  { %90 = vadd.xlane.f32.xlu1 %v919_v7 }
  0x2e   :  { %76 = vadd.xlane.f32.xlu0 %v923_v8 }
  0x2f   :  { %78 = vadd.xlane.f32.xlu1 %v925_v9 }
  0x32   :  { %92 = vadd.xlane.f32.xlu0 %v929_v10 }
  0x33   :  { %94 = vadd.xlane.f32.xlu1 %v931_v11 }
  0x36   :  { %80 = vadd.xlane.f32.xlu0 %v935_v12 }
  0x37   :  { %82 = vadd.xlane.f32.xlu1 %v937_v13 }
  0x3a   :  { %96 = vadd.xlane.f32.xlu0 %v941_v14 }
  0x3b   :  { %98 = vadd.xlane.f32.xlu1 %v943_v15 }
  0xa7   :  { %v69_v16 = vpop.xlane.xlu0 %68 }
  0xa8   :  { %v85_v17 = vpop.xlane.xlu1 %84  ;;  %v101_v18 = vmul.f32 0.0078125, %v69_v16 }
  0xa9   :  { %v109_v19 = vmul.f32 0.0078125, %v85_v17 }
  0xaa   :  { %v948_v20 = vsub.f32 %v899_v0, %v101_v18 }
  0xab   :  { %v951_v21 = vsub.f32 %v901_v1, %v109_v19  ;;  %v71_v22 = vpop.xlane.xlu0 %70 }
  0xac   :  { %v87_v23 = vpop.xlane.xlu1 %86  ;;  %v102_v24 = vmul.f32 0.0078125, %v71_v22  ;;  %v133_v25 = vmul.f32 %v948_v20, %v948_v20 }
  0xad   :  { %v110_v26 = vmul.f32 0.0078125, %v87_v23  ;;  %v141_v29 = vmul.f32 %v951_v21, %v951_v21 }
  0xae   :  { %v956_v27 = vsub.f32 %v905_v2, %v102_v24  ;;  %149 = vadd.xlane.f32.xlu0 %v133_v25 }
  0xaf   :  { %v959_v28 = vsub.f32 %v907_v3, %v110_v26  ;;  %v73_v30 = vpop.xlane.xlu0 %72 }
  0xb0   :  { %v75_v31 = vpop.xlane.xlu1 %74  ;;  %v103_v32 = vmul.f32 0.0078125, %v73_v30  ;;  %v134_v33 = vmul.f32 %v956_v27, %v956_v27 }
  0xb1   :  { %v104_v34 = vmul.f32 0.0078125, %v75_v31  ;;  %v142_v37 = vmul.f32 %v959_v28, %v959_v28 }
  0xb2   :  { %v966_v35 = vsub.f32 %v909_v4, %v103_v32  ;;  %165 = vadd.xlane.f32.xlu0 %v141_v29  ;;  %151 = vadd.xlane.f32.xlu1 %v134_v33 }
  0xb3   :  { %v969_v36 = vsub.f32 %v913_v5, %v104_v34  ;;  %v89_v38 = vpop.xlane.xlu0 %88 }
  0xb4   :  { %v91_v39 = vpop.xlane.xlu1 %90  ;;  %v111_v40 = vmul.f32 0.0078125, %v89_v38  ;;  %v135_v41 = vmul.f32 %v966_v35, %v966_v35  ;;  %v715_v38 = vld [vmem:[#allocation7 + $0x38] sm:$0xff]  }
  0xb5   :  { %v112_v42 = vmul.f32 0.0078125, %v91_v39  ;;  %v136_v45 = vmul.f32 %v969_v36, %v969_v36  ;;  %660 = vmatprep.subr.bf16.mxu0 %v715_v38  ;;  %692 = vmatprep.subr.bf16.mxu1 %v715_v38  ;;  %v716_v39 = vld [vmem:[#allocation7 + $0x30] sm:$0xff]  }
  0xb6   :  { %v976_v43 = vsub.f32 %v915_v6, %v111_v40  ;;  %167 = vadd.xlane.f32.xlu1 %v142_v37  ;;  %153 = vadd.xlane.f32.xlu0 %v135_v41  ;;  %v717_v40 = vld [vmem:[#allocation7 + $0x28] sm:$0xff]   ;;  %v718_v41 = vld [vmem:[#allocation7 + $0x20] sm:$0xff]  }
  0xb7   :  { %v979_v44 = vsub.f32 %v919_v7, %v112_v42  ;;  %v77_v46 = vpop.xlane.xlu0 %76  ;;  %661 = vmatpush3.bf16.msra.mxu0 %v715_v38  ;;  %700 = vmatpush3.bf16.msra.mxu1 %v715_v38  ;;  %v719_v42 = vld [vmem:[#allocation7 + $0x18] sm:$0xff]  }
  0xb8   :  { %v79_v47 = vpop.xlane.xlu1 %78  ;;  %v105_v48 = vmul.f32 0.0078125, %v77_v46  ;;  %v143_v49 = vmul.f32 %v976_v43, %v976_v43  ;;  %662 = vmatprep.subr.bf16.mxu0 %v716_v39  ;;  %693 = vmatprep.subr.bf16.mxu1 %v716_v39  ;;  %v721_v46 = vld [vmem:[#allocation7 + $0x8] sm:$0xff]  }
  0xb9   :  { %v106_v50 = vmul.f32 0.0078125, %v79_v47  ;;  %v144_v53 = vmul.f32 %v979_v44, %v979_v44  ;;  %v722_v47 = vld [vmem:[#allocation7] sm:$0xff]  }
  0xba   :  { %v986_v51 = vsub.f32 %v923_v8, %v105_v48  ;;  %155 = vadd.xlane.f32.xlu1 %v136_v45  ;;  %169 = vadd.xlane.f32.xlu0 %v143_v49  ;;  %v720_v45 = vld [vmem:[#allocation7 + $0x10] sm:$0xff]  }
  0xbb   :  { %v989_v52 = vsub.f32 %v925_v9, %v106_v50  ;;  %v93_v54 = vpop.xlane.xlu0 %92  ;;  %663 = vmatpush3.bf16.msra.mxu0 %v716_v39  ;;  %701 = vmatpush3.bf16.msra.mxu1 %v716_v39 }
  0xbc   :  { %v95_v55 = vpop.xlane.xlu1 %94  ;;  %v113_v56 = vmul.f32 0.0078125, %v93_v54  ;;  %v137_v57 = vmul.f32 %v986_v51, %v986_v51  ;;  %664 = vmatprep.subr.bf16.mxu0 %v717_v40  ;;  %694 = vmatprep.subr.bf16.mxu1 %v717_v40 }
  0xbd   :  { %v114_v58 = vmul.f32 0.0078125, %v95_v55  ;;  %v138_v61 = vmul.f32 %v989_v52, %v989_v52 }
  0xbe   :  { %v996_v59 = vsub.f32 %v929_v10, %v113_v56  ;;  %171 = vadd.xlane.f32.xlu1 %v144_v53  ;;  %157 = vadd.xlane.f32.xlu0 %v137_v57 }
  0xbf   :  { %v999_v60 = vsub.f32 %v931_v11, %v114_v58  ;;  %v81_v62 = vpop.xlane.xlu0 %80  ;;  %665 = vmatpush3.bf16.msra.mxu0 %v717_v40  ;;  %702 = vmatpush3.bf16.msra.mxu1 %v717_v40 }
  0xc0   :  { %v83_v63 = vpop.xlane.xlu1 %82  ;;  %v107_v16 = vmul.f32 0.0078125, %v81_v62  ;;  %v145_v17 = vmul.f32 %v996_v59, %v996_v59  ;;  %666 = vmatprep.subr.bf16.mxu0 %v718_v41  ;;  %695 = vmatprep.subr.bf16.mxu1 %v718_v41 }
  0xc1   :  { %v108_v18 = vmul.f32 0.0078125, %v83_v63  ;;  %v146_v23 = vmul.f32 %v999_v60, %v999_v60 }
  0xc2   :  { %v1006_v19 = vsub.f32 %v935_v12, %v107_v16  ;;  %159 = vadd.xlane.f32.xlu1 %v138_v61  ;;  %173 = vadd.xlane.f32.xlu0 %v145_v17 }
  0xc3   :  { %v1009_v22 = vsub.f32 %v937_v13, %v108_v18  ;;  %v97_v24 = vpop.xlane.xlu0 %96  ;;  %667 = vmatpush3.bf16.msra.mxu0 %v718_v41  ;;  %703 = vmatpush3.bf16.msra.mxu1 %v718_v41 }
  0xc4   :  { %v99_v25 = vpop.xlane.xlu1 %98  ;;  %v115_v26 = vmul.f32 0.0078125, %v97_v24  ;;  %v139_v29 = vmul.f32 %v1006_v19, %v1006_v19  ;;  %668 = vmatprep.subr.bf16.mxu0 %v719_v42  ;;  %696 = vmatprep.subr.bf16.mxu1 %v719_v42 }
  0xc5   :  { %v116_v30 = vmul.f32 0.0078125, %v99_v25  ;;  %v140_v33 = vmul.f32 %v1009_v22, %v1009_v22 }
  0xc6   :  { %v1016_v31 = vsub.f32 %v941_v14, %v115_v26  ;;  %175 = vadd.xlane.f32.xlu1 %v146_v23  ;;  %161 = vadd.xlane.f32.xlu0 %v139_v29 }
  0xc7   :  { %v1019_v32 = vsub.f32 %v943_v15, %v116_v30  ;;  %669 = vmatpush3.bf16.msra.mxu0 %v719_v42  ;;  %704 = vmatpush3.bf16.msra.mxu1 %v719_v42 }
  0xc8   :  { %v147_v34 = vmul.f32 %v1016_v31, %v1016_v31  ;;  %670 = vmatprep.subr.bf16.mxu0 %v720_v45  ;;  %697 = vmatprep.subr.bf16.mxu1 %v720_v45 }
  0xc9   :  { %v148_v37 = vmul.f32 %v1019_v32, %v1019_v32 }
  0xca   :  { %163 = vadd.xlane.f32.xlu1 %v140_v33  ;;  %177 = vadd.xlane.f32.xlu0 %v147_v34 }
  0xcb   :  { %671 = vmatpush3.bf16.msra.mxu0 %v720_v45  ;;  %705 = vmatpush3.bf16.msra.mxu1 %v720_v45 }
  0xcc   :  { %672 = vmatprep.subr.bf16.mxu0 %v721_v46  ;;  %698 = vmatprep.subr.bf16.mxu1 %v721_v46 }
  0xce   :  { %179 = vadd.xlane.f32.xlu1 %v148_v37 }
  0xcf   :  { %673 = vmatpush3.bf16.msra.mxu0 %v721_v46  ;;  %706 = vmatpush3.bf16.msra.mxu1 %v721_v46 }
  0xd0   :  { %674 = vmatprep.subr.bf16.mxu0 %v722_v47  ;;  %699 = vmatprep.subr.bf16.mxu1 %v722_v47 }
  0xd3   :  { %675 = vmatpush3.bf16.msra.mxu0 %v722_v47  ;;  %707 = vmatpush3.bf16.msra.mxu1 %v722_v47 }
 0x137   :  { %v150_v48 = vpop.xlane.xlu0 %149 }
 0x138   :  { %v181_v49 = vmul.f32 0.007874016, %v150_v48 }
 0x13a   :  { %723 = vrsqrt.f32 %v181_v49  ;;  %vm199_vm0 = vcmp.eq.f32.partialorder %v181_v49, inf  ;;  %vm201_vm1 = vcmp.eq.f32.partialorder %v181_v49, 0.0  ;;  %v202_v30 = vand.u32 2147483648, %v181_v49 }
 0x13b   :  { %v152_v50 = vpop.xlane.xlu1 %151  ;;  %v166_v53 = vpop.xlane.xlu0 %165 }
 0x13c   :  { %v1027_v54 = vmul.f32 0.007874016, %v152_v50  ;;  %v1029_v55 = vmul.f32 0.007874016, %v166_v53 }
 0x13e   :  { %725 = vrsqrt.f32 %v1027_v54  ;;  %vm206_vm2 = vcmp.eq.f32.partialorder %v1027_v54, inf  ;;  %vm255_vm3 = vcmp.eq.f32.partialorder %v1029_v55, inf  ;;  %vm208_vm4 = vcmp.eq.f32.partialorder %v1027_v54, 0.0 }
 0x13f   :  { %v168_v56 = vpop.xlane.xlu1 %167  ;;  %v154_v57 = vpop.xlane.xlu0 %153  ;;  %727 = vrsqrt.f32 %v1029_v55  ;;  %vm257_vm13 = vcmp.eq.f32.partialorder %v1029_v55, 0.0 }
 0x140   :  { %v1033_v58 = vmul.f32 0.007874016, %v154_v57  ;;  %v1035_v61 = vmul.f32 0.007874016, %v168_v56 }
 0x142   :  { %729 = vrsqrt.f32 %v1033_v58  ;;  %vm213_vm5 = vcmp.eq.f32.partialorder %v1033_v58, inf  ;;  %vm215_vm6 = vcmp.eq.f32.partialorder %v1033_v58, 0.0  ;;  %v216_v47 = vand.u32 2147483648, %v1033_v58 }
 0x143   :  { %v156_v62 = vpop.xlane.xlu1 %155  ;;  %v170_v63 = vpop.xlane.xlu0 %169  ;;  %731 = vrsqrt.f32 %v1035_v61  ;;  %vm262_vm11 = vcmp.eq.f32.partialorder %v1035_v61, inf }
 0x144   :  { %v1038_v16 = vmul.f32 0.007874016, %v156_v62  ;;  %v1040_v17 = vmul.f32 0.007874016, %v170_v63 }
 0x146   :  { %733 = vrsqrt.f32 %v1038_v16  ;;  %vm220_vm7 = vcmp.eq.f32.partialorder %v1038_v16, inf  ;;  %vm222_vm8 = vcmp.eq.f32.partialorder %v1038_v16, 0.0  ;;  %v223_v50 = vand.u32 2147483648, %v1038_v16 }
 0x147   :  { %v724_v18 = vpop.eup %723  ;;  %735 = vrsqrt.f32 %v1040_v17  ;;  %v172_v23 = vpop.xlane.xlu1 %171  ;;  %vm269_vm9 = vcmp.eq.f32.partialorder %v1040_v17, inf  ;;  %vm271_vm10 = vcmp.eq.f32.partialorder %v1040_v17, 0.0 }
 0x148   :  { %v158_v24 = vpop.xlane.xlu0 %157  ;;  %v198_v25 = vmul.f32 %v724_v18, %v181_v49  ;;  %v1045_v26 = vmul.f32 0.007874016, %v172_v23 }
 0x149   :  { %v1047_v29 = vmul.f32 0.007874016, %v158_v24  ;;  %v272_v24 = vand.u32 2147483648, %v1040_v17 }
 0x14a   :  { %737 = vrsqrt.f32 %v1045_v26  ;;  %v200_v39 = vsel %vm199_vm0, %v181_v49, %v198_v25  ;;  %vm276_vm12 = vcmp.eq.f32.partialorder %v1045_v26, inf  ;;  %vm278_vm14 = vcmp.eq.f32.partialorder %v1045_v26, 0.0 }
 0x14b   :  { %739 = vrsqrt.f32 %v1047_v29  ;;  %v160_v34 = vpop.xlane.xlu1 %159  ;;  %v726_v38 = vpop.eup %725  ;;  %v203_v57 = vsel %vm201_vm1, %v202_v30, %v200_v39  ;;  %v279_v30 = vand.u32 2147483648, %v1045_v26  ;;  %vm227_vm15 = vcmp.eq.f32.partialorder %v1047_v29, inf }
 0x14c   :  { %v174_v37 = vpop.xlane.xlu0 %173  ;;  %v1054_v40 = vmul.f32 0.007874016, %v160_v34  ;;  %v728_v42 = vpop.eup %727  ;;  %v205_v48 = vmul.f32 %v726_v38, %v1027_v54  ;;  %v309_v34 = vadd.f32 1e-06, %v203_v57  ;;  %vm229_vm0 = vcmp.eq.f32.partialorder %v1047_v29, 0.0 }
 0x14d   :  { %v1056_v41 = vmul.f32 0.007874016, %v174_v37  ;;  %v254_v63 = vmul.f32 %v728_v42, %v1029_v55  ;;  %vm264_vm1 = vcmp.eq.f32.partialorder %v1035_v61, 0.0 }
 0x14e   :  { %741 = vrsqrt.f32 %v1054_v40  ;;  %v207_v38 = vsel %vm206_vm2, %v1027_v54, %v205_v48  ;;  %v230_v48 = vand.u32 2147483648, %v1047_v29  ;;  %vm234_vm2 = vcmp.eq.f32.partialorder %v1054_v40, inf }
 0x14f   :  { %743 = vrsqrt.f32 %v1056_v41  ;;  %v176_v53 = vpop.xlane.xlu1 %175  ;;  %v730_v62 = vpop.eup %729  ;;  %v237_v33 = vand.u32 2147483648, %v1054_v40 }
 0x150   :  { %v162_v56 = vpop.xlane.xlu0 %161  ;;  %v1074_v18 = vmul.f32 0.007874016, %v176_v53  ;;  %v212_v23 = vmul.f32 %v730_v62, %v1033_v58  ;;  %v732_v49 = vpop.eup %731 }
 0x151   :  { %v1080_v25 = vmul.f32 0.007874016, %v162_v56  ;;  %v256_v56 = vsel %vm255_vm3, %v1029_v55, %v254_v63  ;;  %v261_v63 = vmul.f32 %v732_v49, %v1035_v61  ;;  %vm236_vm3 = vcmp.eq.f32.partialorder %v1054_v40, 0.0 }
 0x152   :  { %745 = vrsqrt.f32 %v1074_v18  ;;  %v214_v39 = vsel %vm213_vm5, %v1033_v58, %v212_v23  ;;  %vm283_vm5 = vcmp.eq.f32.partialorder %v1056_v41, inf }
 0x153   :  { %v734_v37 = vpop.eup %733  ;;  %747 = vrsqrt.f32 %v1080_v25  ;;  %v164_v42 = vpop.xlane.xlu1 %163  ;;  %v217_v57 = vsel %vm215_vm6, %v216_v47, %v214_v39  ;;  %v1313_v47 = vand.u32 2147483648, %v1027_v54  ;;  %vm285_vm6 = vcmp.eq.f32.partialorder %v1056_v41, 0.0 }
 0x154   :  { %v736_v53 = vpop.eup %735  ;;  %v219_v62 = vmul.f32 %v734_v37, %v1038_v16  ;;  %v178_v46 = vpop.xlane.xlu0 %177  ;;  %v311_v23 = vadd.f32 1e-06, %v217_v57  ;;  %v1106_v11 = vmul.f32 0.007874016, %v164_v42  ;;  %749 = vrcp.f32 %v309_v34 }
 0x155   :  { %v268_v45 = vmul.f32 %v736_v53, %v1040_v17  ;;  %v210_v37 = vsel %vm208_vm4, %v1313_v47, %v207_v38  ;;  %v1124_v53 = vmul.f32 0.007874016, %v178_v46  ;;  %vm290_vm4 = vcmp.eq.f32.partialorder %v1074_v18, inf }
 0x156   :  { %v221_v58 = vsel %vm220_vm7, %v1038_v16, %v219_v62  ;;  %751 = vrcp.f32 %v311_v23  ;;  %v310_v23 = vadd.f32 1e-06, %v210_v37  ;;  %v1314_v37 = vand.u32 2147483648, %v1029_v55 }
 0x157   :  { %v738_v39 = vpop.eup %737  ;;  %v224_v42 = vsel %vm222_vm8, %v223_v50, %v221_v58  ;;  %v270_v49 = vsel %vm269_vm9, %v1040_v17, %v268_v45  ;;  %753 = vrsqrt.f32 %v1106_v11  ;;  %v286_v50 = vand.u32 2147483648, %v1056_v41  ;;  %v180_v46 = vpop.xlane.xlu1 %179 }
 0x158   :  { %v740_v57 = vpop.eup %739  ;;  %v312_v62 = vadd.f32 1e-06, %v224_v42  ;;  %v273_v54 = vsel %vm271_vm10, %v272_v24, %v270_v49  ;;  %v275_v34 = vmul.f32 %v738_v39, %v1045_v26  ;;  %v263_v45 = vsel %vm262_vm11, %v1035_v61, %v261_v63 }
 0x159   :  { %v319_v38 = vadd.f32 1e-06, %v273_v54  ;;  %v226_v16 = vmul.f32 %v740_v57, %v1047_v29  ;;  %v259_v63 = vsel %vm257_vm13, %v1314_v37, %v256_v56  ;;  %vm292_vm7 = vcmp.eq.f32.partialorder %v1074_v18, 0.0 }
 0x15a   :  { %755 = vrcp.f32 %v312_v62  ;;  %v277_v17 = vsel %vm276_vm12, %v1045_v26, %v275_v34  ;;  %v1153_v62 = vmul.f32 0.007874016, %v180_v46  ;;  %vm241_vm8 = vcmp.eq.f32.partialorder %v1080_v25, inf }
 0x15b   :  { %v742_v24 = vpop.eup %741  ;;  %757 = vrcp.f32 %v319_v38  ;;  %v280_v58 = vsel %vm278_vm14, %v279_v30, %v277_v17  ;;  %v228_v47 = vsel %vm227_vm15, %v1047_v29, %v226_v16  ;;  %v1315_v29 = vand.u32 2147483648, %v1035_v61 }
 0x15c   :  { %v744_v39 = vpop.eup %743  ;;  %v320_v42 = vadd.f32 1e-06, %v280_v58  ;;  %v231_v49 = vsel %vm229_vm0, %v230_v48, %v228_v47  ;;  %v233_v57 = vmul.f32 %v742_v24, %v1054_v40  ;;  %759 = vrsqrt.f32 %v1124_v53 }
 0x15d   :  { %v313_v26 = vadd.f32 1e-06, %v231_v49  ;;  %v282_v30 = vmul.f32 %v744_v39, %v1056_v41  ;;  %761 = vrcp.f32 %v310_v23  ;;  %v266_v56 = vsel %vm264_vm1, %v1315_v29, %v263_v45 }
 0x15e   :  { %763 = vrcp.f32 %v320_v42  ;;  %v235_v55 = vsel %vm234_vm2, %v1054_v40, %v233_v57  ;;  %v317_v38 = vadd.f32 1e-06, %v259_v63  ;;  %v293_v45 = vand.u32 2147483648, %v1074_v18 }
 0x15f   :  { %v746_v48 = vpop.eup %745  ;;  %765 = vrcp.f32 %v313_v26  ;;  %v238_v54 = vsel %vm236_vm3, %v237_v33, %v235_v55  ;;  %v284_v34 = vsel %vm283_vm5, %v1056_v41, %v282_v30  ;;  %v244_v24 = vand.u32 2147483648, %v1080_v25 }
 0x160   :  { %v748_v16 = vpop.eup %747  ;;  %v314_v23 = vadd.f32 1e-06, %v238_v54  ;;  %v287_v17 = vsel %vm285_vm6, %v286_v50, %v284_v34  ;;  %v289_v46 = vmul.f32 %v746_v48, %v1074_v18  ;;  %767 = vrsqrt.f32 %v1153_v62 }
 0x161   :  { %v321_v61 = vadd.f32 1e-06, %v287_v17  ;;  %v240_v40 = vmul.f32 %v748_v16, %v1080_v25  ;;  %v318_v41 = vadd.f32 1e-06, %v266_v56  ;;  %v750_v50 = vpop.eup %749  ;;  %vm243_vm9 = vcmp.eq.f32.partialorder %v1080_v25, 0.0 }
 0x162   :  { %769 = vrcp.f32 %v314_v23  ;;  %v291_v33 = vsel %vm290_vm4, %v1074_v18, %v289_v46  ;;  %v1186_v42 = vstv %s1305_s0  ;;  %vm248_vm10 = vcmp.eq.f32.partialorder %v1106_v11, inf }
 0x163   :  { %771 = vrcp.f32 %v321_v61  ;;  %v294_v58 = vsel %vm292_vm7, %v293_v45, %v291_v33  ;;  %v242_v47 = vsel %vm241_vm8, %v1080_v25, %v240_v40  ;;  %v752_v37 = vpop.eup %751  ;;  %v251_v25 = vand.u32 2147483648, %v1106_v11 }
 0x164   :  { %v322_v63 = vadd.f32 1e-06, %v294_v58  ;;  %v245_v39 = vsel %vm243_vm9, %v244_v24, %v242_v47  ;;  %773 = vrcp.f32 %v317_v38  ;;  %v754_v49 = vpop.eup %753  ;;  %v345_v26 = vmul.f32 %v752_v37, %v1186_v42 }
 0x165   :  { %v315_v57 = vadd.f32 1e-06, %v245_v39  ;;  %775 = vrcp.f32 %v318_v41  ;;  %v247_v18 = vmul.f32 %v754_v49, %v1106_v11  ;;  %v343_v55 = vmul.f32 %v750_v50, %v1186_v42 }
 0x166   :  { %777 = vrcp.f32 %v322_v63  ;;  %vm250_vm11 = vcmp.eq.f32.partialorder %v1106_v11, 0.0  ;;  %v1198_v48 = vstv %s1306_s1  ;;  %vm297_vm12 = vcmp.eq.f32.partialorder %v1124_v53, inf }
 0x167   :  { %v756_v30 = vpop.eup %755  ;;  %779 = vrcp.f32 %v315_v57  ;;  %v249_v56 = vsel %vm248_vm10, %v1106_v11, %v247_v18  ;;  %vm299_vm13 = vcmp.eq.f32.partialorder %v1124_v53, 0.0  ;;  %v300_v16 = vand.u32 2147483648, %v1124_v53 }
 0x168   :  { %v758_v29 = vpop.eup %757  ;;  %v346_v54 = vmul.f32 %v756_v30, %v1186_v42  ;;  %v252_v38 = vsel %vm250_vm11, %v251_v25, %v249_v56  ;;  %v361_v11 = vmul.f32 %v345_v26, %v966_v35  ;;  %vm304_vm14 = vcmp.eq.f32.partialorder %v1153_v62, inf }
 0x169   :  { %v760_v34 = vpop.eup %759  ;;  %v316_v17 = vadd.f32 1e-06, %v252_v38  ;;  %vm306_vm15 = vcmp.eq.f32.partialorder %v1153_v62, 0.0  ;;  %v359_v33 = vmul.f32 %v343_v55, %v948_v20  ;;  %v307_v47 = vand.u32 2147483648, %v1153_v62 }
 0x16a   :  { %v762_v23 = vpop.eup %761  ;;  %v296_v46 = vmul.f32 %v760_v34, %v1124_v53  ;;  %v362_v61 = vmul.f32 %v346_v54, %v969_v36  ;;  %v379_v49 = vadd.f32 %v1198_v48, %v361_v11  ;;  %v353_v57 = vmul.f32 %v758_v29, %v1186_v42 }
 0x16b   :  { %v764_v45 = vpop.eup %763  ;;  %v344_v40 = vmul.f32 %v762_v23, %v1186_v42  ;;  %781 = vrcp.f32 %v316_v17  ;;  %v377_v26 = vadd.f32 %v1198_v48, %v359_v33 }
 0x16c   :  { %v766_v24 = vpop.eup %765  ;;  %v298_v41 = vsel %vm297_vm12, %v1124_v53, %v296_v46  ;;  %v380_v50 = vadd.f32 %v1198_v48, %v362_v61  ;;  %v354_v58 = vmul.f32 %v764_v45, %v1186_v42  ;;  %v369_v17 = vmul.f32 %v353_v57, %v976_v43 }
 0x16d   :  { %v768_v35 = vpop.eup %767  ;;  %v301_v36 = vsel %vm299_vm13, %v300_v16, %v298_v41  ;;  %v360_v37 = vmul.f32 %v344_v40, %v956_v27  ;;  %v347_v63 = vmul.f32 %v766_v24, %v1186_v42 }
 0x16e   :  { %v323_v39 = vadd.f32 1e-06, %v301_v36  ;;  %v303_v20 = vmul.f32 %v768_v35, %v1153_v62  ;;  %v370_v53 = vmul.f32 %v354_v58, %v979_v44  ;;  %v394_v56 = vpack.c.bf16 %v380_v50, %v379_v49 }
 0x16f   :  { %v770_v18 = vpop.eup %769  ;;  %v378_v30 = vadd.f32 %v1198_v48, %v360_v37  ;;  %v363_v25 = vmul.f32 %v347_v63, %v986_v51  ;;  %v387_v50 = vadd.f32 %v1198_v48, %v369_v17 }
 0x170   :  { %v772_v55 = vpop.eup %771  ;;  %783 = vrcp.f32 %v323_v39  ;;  %v305_v27 = vsel %vm304_vm14, %v1153_v62, %v303_v20  ;;  %v348_v54 = vmul.f32 %v770_v18, %v1186_v42  ;;  %v388_v45 = vadd.f32 %v1198_v48, %v370_v53 }
 0x171   :  { %v774_v34 = vpop.eup %773  ;;  %v308_v29 = vsel %vm306_vm15, %v307_v47, %v305_v27  ;;  %v393_v38 = vpack.c.bf16 %v378_v30, %v377_v26  ;;  %v355_v16 = vmul.f32 %v772_v55, %v1186_v42  ;;  %v381_v62 = vadd.f32 %v1198_v48, %v363_v25 }
 0x172   :  { %v776_v23 = vpop.eup %775  ;;  %v324_v44 = vadd.f32 1e-06, %v308_v29  ;;  %v351_v51 = vmul.f32 %v774_v34, %v1186_v42  ;;  %v364_v46 = vmul.f32 %v348_v54, %v989_v52  ;;  %v398_v37 = vpack.c.bf16 %v388_v45, %v387_v50 }
 0x173   :  { %v778_v11 = vpop.eup %777  ;;  %676 = vmatprep.mubr.bf16.mxu0 %v393_v38  ;;  %v352_v61 = vmul.f32 %v776_v23, %v1186_v42  ;;  %v371_v40 = vmul.f32 %v355_v16, %v996_v59  ;;  %v1265_v38 = vld [vmem:[%s1309_s4] ss:$0 sm:$0xff]  ;;  %s859_s4 = smov [#allocation9]  }
 0x174   :  { %v780_v33 = vpop.eup %779  ;;  %785 = vrcp.f32 %v324_v44  ;;  %v367_v24 = vmul.f32 %v351_v51, %v951_v21  ;;  %677 = vmatmul.mubr.bf16.vlgmr.msra.gmra.mxu0 %v394_v56  ;;  %v382_v41 = vadd.f32 %v1198_v48, %v364_v46  ;;  %v356_v43 = vmul.f32 %v778_v11, %v1186_v42  ;;  %s622_s9 = sshll.u32 %s859_s4, 4  ;;  %s623_s9 = int_to_ptr.vmem [resolvable:$true] %s622_s9 }
 0x175   :  { %v368_v52 = vmul.f32 %v352_v61, %v959_v28  ;;  %v349_v36 = vmul.f32 %v780_v33, %v1186_v42  ;;  %v389_v21 = vadd.f32 %v1198_v48, %v371_v40  ;;  %s827_s10 = scalar_lea.vmem %s623_s9, 2048  ;;  %p832_p11 = scmp.lt.s32.totalorder %s623_s9, %s623_s9 }
 0x176   :  { %v395_v58 = vpack.c.bf16 %v382_v41, %v381_v62  ;;  %v372_v35 = vmul.f32 %v356_v43, %v999_v60  ;;  %v385_v59 = vadd.f32 %v1198_v48, %v367_v24  ;;  %p828_p10 = scmp.ne.s32.totalorder %s623_s9, %s827_s10  ;;  %p833_p12 = scmp.lt.s32.totalorder %s827_s10, %s827_s10 }
 0x177   :  { %v386_v47 = vadd.f32 %v1198_v48, %v368_v52  ;;  %v365_v57 = vmul.f32 %v349_v36, %v1006_v19 }
 0x178   :  { %680 = vmatprep.mubr.bf16.mxu0 %v395_v58  ;;  %v390_v63 = vadd.f32 %v1198_v48, %v372_v35  ;;  %v782_v39 = vpop.eup %781  ;;  %p834_p13 = por %p833_p12, %p832_p11 }
 0x179   :  { %v397_v20 = vpack.c.bf16 %v386_v47, %v385_v59  ;;  %v350_v49 = vmul.f32 %v782_v39, %v1186_v42  ;;  %v383_v26 = vadd.f32 %v1198_v48, %v365_v57 }
 0x17a   :  { %v399_v28 = vpack.c.bf16 %v390_v63, %v389_v21  ;;  %p835_p0 = pnand %p834_p13, %p828_p10 }
 0x17b   :  { %684 = vmatprep.mubr.bf16.mxu1 %v397_v20  ;;  %v366_v60 = vmul.f32 %v350_v49, %v1009_v22 }
 0x17c   :  { %685 = vmatmul.mubr.bf16.vlgmr.msra.gmra.mxu1 %v398_v37 }
 0x17d   :  { %v784_v18 = vpop.eup %783  ;;  %688 = vmatprep.mubr.bf16.mxu1 %v399_v28  ;;  %v384_v30 = vadd.f32 %v1198_v48, %v366_v60 }
 0x17e   :  { %v357_v53 = vmul.f32 %v784_v18, %v1186_v42 }
 0x17f   :  { %v396_v25 = vpack.c.bf16 %v384_v30, %v383_v26 }
 0x180   :  { %v373_v56 = vmul.f32 %v357_v53, %v1016_v31 }
 0x181   :  { %v786_v55 = vpop.eup %785  ;;  %681 = vmatmul.mubr.bf16.gmra.mxu0 %v396_v25 }
 0x182   :  { %v358_v27 = vmul.f32 %v786_v55, %v1186_v42  ;;  %v391_v54 = vadd.f32 %v1198_v48, %v373_v56 }
 0x184   :  { %v374_v19 = vmul.f32 %v358_v27, %v1019_v32 }
 0x186   :  { %v392_v22 = vadd.f32 %v1198_v48, %v374_v19 }
 0x188   :  { %v400_v34 = vpack.c.bf16 %v392_v22, %v391_v54 }
 0x18a   :  { %689 = vmatmul.mubr.bf16.gmra.mxu1 %v400_v34 }
 0x234   :  { %v678_v29 = vpop.f32.mrf.mxu0 }
 0x235   :  { %v564_v16 = vadd.f32 %v678_v29, %v909_v4 }
 0x236   :  { %v499_v23 = vpop.f32.mrf.mxu0 }
 0x237   :  { %v587_v42 = vadd.f32 %v1265_v38, %v564_v16  ;;  %v562_v31 = vadd.f32 %v499_v23, %v899_v0 }
 0x238   :  { %v679_v32 = vpop.f32.mrf.mxu0 }
 0x239   :  { %603 = vst [vmem:[#allocation9 + $0x10] sm:$0xff] %v587_v42  ;;  %v585_v44 = vadd.f32 %v1265_v38, %v562_v31  ;;  %v565_v48 = vadd.f32 %v679_v32, %v913_v5 }
 0x23a   :  { %v502_v51 = vpop.f32.mrf.mxu0 }
 0x23b   :  { %601 = vst [vmem:[#allocation9] sm:$0xff] %v585_v44  ;;  %v588_v17 = vadd.f32 %v1265_v38, %v565_v48  ;;  %v563_v46 = vadd.f32 %v502_v51, %v905_v2 }
 0x23c   :  { %v686_v11 = vpop.f32.mrf.mxu1 }
 0x23d   :  { %604 = vst [vmem:[#allocation9 + $0x18] sm:$0xff] %v588_v17  ;;  %v572_v4 = vadd.f32 %v686_v11, %v915_v6  ;;  %v586_v61 = vadd.f32 %v1265_v38, %v563_v46 }
 0x23e   :  { %v531_v45 = vpop.f32.mrf.mxu1 }
 0x23f   :  { %v595_v0 = vadd.f32 %v1265_v38, %v572_v4  ;;  %602 = vst [vmem:[#allocation9 + $0x8] sm:$0xff] %v586_v61  ;;  %v570_v62 = vadd.f32 %v531_v45, %v901_v1 }
 0x240   :  { %v687_v40 = vpop.f32.mrf.mxu1 }
 0x241   :  { %611 = vst [vmem:[#allocation9 + $0x50] sm:$0xff] %v595_v0  ;;  %v593_v5 = vadd.f32 %v1265_v38, %v570_v62  ;;  %v573_v33 = vadd.f32 %v687_v40, %v919_v7  ;;  %v682_v2 = vpop.f32.mrf.mxu0 }
 0x242   :  { %v534_v24 = vpop.f32.mrf.mxu1  ;;  %v568_v43 = vadd.f32 %v682_v2, %v935_v12 }
 0x243   :  { %609 = vst [vmem:[#allocation9 + $0x40] sm:$0xff] %v593_v5  ;;  %v596_v41 = vadd.f32 %v1265_v38, %v573_v33  ;;  %v571_v6 = vadd.f32 %v534_v24, %v907_v3  ;;  %v515_v52 = vpop.f32.mrf.mxu0 }
 0x244   :  { %v591_v1 = vadd.f32 %v1265_v38, %v568_v43  ;;  %v566_v58 = vadd.f32 %v515_v52, %v923_v8 }
 0x245   :  { %612 = vst [vmem:[#allocation9 + $0x58] sm:$0xff] %v596_v41  ;;  %v594_v50 = vadd.f32 %v1265_v38, %v571_v6  ;;  %v683_v35 = vpop.f32.mrf.mxu0 }
 0x246   :  { %607 = vst [vmem:[#allocation9 + $0x30] sm:$0xff] %v591_v1  ;;  %v589_v7 = vadd.f32 %v1265_v38, %v566_v58  ;;  %v569_v36 = vadd.f32 %v683_v35, %v937_v13 }
 0x247   :  { %610 = vst [vmem:[#allocation9 + $0x48] sm:$0xff] %v594_v50  ;;  %v518_v59 = vpop.f32.mrf.mxu0 }
 0x248   :  { %605 = vst [vmem:[#allocation9 + $0x20] sm:$0xff] %v589_v7  ;;  %v592_v3 = vadd.f32 %v1265_v38, %v569_v36  ;;  %v567_v12 = vadd.f32 %v518_v59, %v925_v9 }
 0x24a   :  { %v690_v47 = vpop.f32.mrf.mxu1  ;;  %608 = vst [vmem:[#allocation9 + $0x38] sm:$0xff] %v592_v3  ;;  %v590_v21 = vadd.f32 %v1265_v38, %v567_v12 }
 0x24b   :  { %v576_v37 = vadd.f32 %v690_v47, %v941_v14  ;;  %v1316_v14 = vld [vmem:[#allocation13_spill] sm:$0xff] }
 0x24c   :  { %v547_v8 = vpop.f32.mrf.mxu1  ;;  %606 = vst [vmem:[#allocation9 + $0x28] sm:$0xff] %v590_v21 }
 0x24d   :  { %v599_v63 = vadd.f32 %v1265_v38, %v576_v37  ;;  %v574_v39 = vadd.f32 %v547_v8, %v929_v10 }
 0x24e   :  { %v691_v20 = vpop.f32.mrf.mxu1 }
 0x24f   :  { %615 = vst [vmem:[#allocation9 + $0x70] sm:$0xff] %v599_v63  ;;  %v597_v13 = vadd.f32 %v1265_v38, %v574_v39  ;;  %v577_v28 = vadd.f32 %v691_v20, %v943_v15 }
 0x250   :  { %v550_v49 = vpop.f32.mrf.mxu1 }
 0x251   :  { %613 = vst [vmem:[#allocation9 + $0x60] sm:$0xff] %v597_v13  ;;  %v600_v9 = vadd.f32 %v1265_v38, %v577_v28  ;;  %v575_v57 = vadd.f32 %v550_v49, %v1316_v14 }
 0x253   :  { %616 = vst [vmem:[#allocation9 + $0x78] sm:$0xff] %v600_v9  ;;  %v598_v60 = vadd.f32 %v1265_v38, %v575_v57 }
 0x255   :  { %614 = vst [vmem:[#allocation9 + $0x68] sm:$0xff] %v598_v60 }
 0x256   :  { %838 = shalt.err (!%p835_p0)
}
 0x257   :  { %628 = dma.vmem_to_hbm [thread:$0]  %s623_s9, 2048, %s1310_s5, [#allocation6], %s854_s21, %s854_s21, %s855_s22  }
 0x258   :  { %851 = dma.done.wait [#allocation6], 2048  }
 0x259   :  { %852 = vsyncadd [#allocation6], 4294965248 }
 0x25a   :  { %632 = vsyncpa [#allocation5], 1 }
 0x25b   :  { %633 = vsyncpa [#allocation8], 1 }
 0x25c   :  { %634 = vsyncpa [#allocation6], 1 }

</bundles_post_ra>
